<compile_context>
chip_gen: v7x
topology: tpu7x:2x2x1
jax: 0.10.0
libtpu: 0.0.40
codegen_flags: <defaults>
</compile_context>

<pallas_src>
import functools

import jax
import jax.numpy as jnp
from jax.experimental import pallas as pl
from jax.experimental.pallas import tpu as pltpu


def _round_up(v, m):
    return (v + m - 1) // m * m


def _cdiv(a, b):
    return -(-a // b)


# --------------------------------------------------------------------------
# Kernel body: fused 3-layer MLP on one row-tile (x already noise-injected).
# --------------------------------------------------------------------------
def gen_mlp_kernel(x_ref,
                   w1_ref, b1_ref,
                   w2_ref, b2_ref,
                   w3_ref, b3_ref,
                   o_ref):
    mm_dtype = w1_ref.dtype  # matmul operand dtype (bf16 default, or f32)

    # fc1 + ReLU  (in_dim -> 256); f32 accumulation on the MXU.
    h = jnp.dot(x_ref[...], w1_ref[...],
                preferred_element_type=jnp.float32) + b1_ref[...]
    h = jnp.maximum(h, 0.0).astype(mm_dtype)

    # fc2 + ReLU  (256 -> 1024)
    h = jnp.dot(h, w2_ref[...],
                preferred_element_type=jnp.float32) + b2_ref[...]
    h = jnp.maximum(h, 0.0).astype(mm_dtype)

    # Dropout: inference mode (training=False) -> identity.
    # TODO(synk): training-mode dropout would need pltpu.prng_seed + a
    # per-tile bernoulli mask; the reference forward here is eval-mode.

    # fc_flat + tanh  (1024 -> padded out_dim, lane-dense 128-multiple)
    h = jnp.dot(h, w3_ref[...],
                preferred_element_type=jnp.float32) + b3_ref[...]
    o_ref[...] = jnp.tanh(h).astype(o_ref.dtype)


# --------------------------------------------------------------------------
# One-time parameter preparation (hoisted out of the per-call jit).
# --------------------------------------------------------------------------
def prepare_params(params, matmul_dtype=jnp.bfloat16):
    """Pad fc_flat to a 128-lane multiple and cast weights to matmul_dtype.

    Call once; pass the result to gen_forward. Biases stay f32 (they are
    added to the f32 MXU accumulator).
    Returns (prepared_params, out_dim) where out_dim = num_pred * feat_shape.
    """
    out_dim = params["w3"].shape[1]
    out_pad = _round_up(out_dim, 128)
    w3, b3 = params["w3"], params["b3"]
    if out_pad != out_dim:
        w3 = jnp.pad(w3, ((0, 0), (0, out_pad - out_dim)))
        b3 = jnp.pad(b3, ((0, 0), (0, out_pad - out_dim)))
    prepared = {
        "w1": params["w1"].astype(matmul_dtype),
        "b1": params["b1"].astype(jnp.float32),
        "w2": params["w2"].astype(matmul_dtype),
        "b2": params["b2"].astype(jnp.float32),
        "w3": w3.astype(matmul_dtype),
        "b3": b3.astype(jnp.float32),
    }
    return prepared, out_dim


# --------------------------------------------------------------------------
# Tiled pallas_call over rows of the (already noised) input x.
# --------------------------------------------------------------------------
def _gen_mlp_pallas(x, p, out_dim, tile_m, out_dtype):
    n, in_dim = x.shape
    mm_dtype = p["w1"].dtype
    h1d = p["w1"].shape[1]       # 256
    h2d = p["w2"].shape[1]       # 1024
    out_pad = p["w3"].shape[1]   # round_up(num_pred*feat_shape, 128)

    # Sublane granularity: 8 for 32-bit operands, 16 for packed bf16.
    sub = 8 if jnp.dtype(mm_dtype).itemsize >= 4 else 16
    tile_m = _round_up(max(tile_m, sub), sub)

    # Row tile: as large as requested, but always >= 2 grid blocks when there
    # are enough rows, so the "parallel" grid axis shards across both v7x
    # TensorCores instead of collapsing to a single block.
    if n > sub:
        tm = min(tile_m, _round_up(_cdiv(n, 2), sub))
    else:
        tm = _round_up(max(n, 1), sub)

    n_pad = _round_up(n, tm)
    if n_pad != n:
        x = jnp.pad(x, ((0, n_pad - n), (0, 0)))
    x_in = x.astype(mm_dtype)

    grid = (n_pad // tm,)

    # Row-tiled activations stream; weights/biases have a constant index_map,
    # stay VMEM-resident across the whole grid, and are single-buffered.
    x_spec = pl.BlockSpec((tm, in_dim), lambda i: (i, 0))
    w1_spec = pl.BlockSpec((in_dim, h1d), lambda i: (0, 0),
                           pipeline_mode=pl.Buffered(1))
    b1_spec = pl.BlockSpec((1, h1d), lambda i: (0, 0),
                           pipeline_mode=pl.Buffered(1))
    w2_spec = pl.BlockSpec((h1d, h2d), lambda i: (0, 0),
                           pipeline_mode=pl.Buffered(1))
    b2_spec = pl.BlockSpec((1, h2d), lambda i: (0, 0),
                           pipeline_mode=pl.Buffered(1))
    w3_spec = pl.BlockSpec((h2d, out_pad), lambda i: (0, 0),
                           pipeline_mode=pl.Buffered(1))
    b3_spec = pl.BlockSpec((1, out_pad), lambda i: (0, 0),
                           pipeline_mode=pl.Buffered(1))
    out_spec = pl.BlockSpec((tm, out_pad), lambda i: (i, 0))

    in_item = jnp.dtype(mm_dtype).itemsize
    out_item = jnp.dtype(out_dtype).itemsize
    cost = pl.CostEstimate(
        flops=2 * n_pad * (in_dim * h1d + h1d * h2d + h2d * out_pad),
        transcendentals=n_pad * out_pad,
        bytes_accessed=(n_pad * in_dim * in_item
                        + (in_dim * h1d + h1d * h2d + h2d * out_pad) * in_item
                        + (h1d + h2d + out_pad) * 4
                        + n_pad * out_pad * out_item),
    )

    out = pl.pallas_call(
        gen_mlp_kernel,
        out_shape=jax.ShapeDtypeStruct((n_pad, out_pad), out_dtype),
        grid_spec=pltpu.PrefetchScalarGridSpec(
            num_scalar_prefetch=0,
            grid=grid,
            in_specs=[x_spec,
                      w1_spec, b1_spec,
                      w2_spec, b2_spec,
                      w3_spec, b3_spec],
            out_specs=out_spec,
        ),
        compiler_params=pltpu.CompilerParams(
            dimension_semantics=("parallel",),
            vmem_limit_bytes=32 * 1024 * 1024,
        ),
        cost_estimate=cost,
    )(x_in, p["w1"], p["b1"], p["w2"], p["b2"], p["w3"], p["b3"])

    # Strip the row / lane padding back to the module's logical output shape.
    return out[:n, :out_dim]


@functools.partial(jax.jit, static_argnames=("out_dim", "tile_m", "out_dtype"))
def gen_forward(x, prepared_params, key, out_dim, tile_m=1024,
                out_dtype=jnp.float32):
    """Full Gen forward pass.

    x:               [N, in_dim] float32
    prepared_params: output of prepare_params (padded + cast, done once)
    key:             PRNG key for the Sampling module's N(0,1) noise
    out_dim:         num_pred * feat_shape (static; second return of
                     prepare_params)
    tile_m:          max row tile (1024 default; fine on v5e/v6e/v7x in bf16
                     within the 32 MiB scoped-VMEM budget set below)
    out_dtype:       kernel output dtype (f32 default; bf16 halves writeback
                     since tanh output is bounded in [-1, 1])
    """
    # Sampling: the noise add is fused by XLA with the row padding / cast, so
    # the kernel receives a single pre-noised [N, in_dim] stream.
    # TODO(synk): for very wide in_dim / huge N, generate the noise in-kernel
    # (pltpu.prng_seed + prng_random_bits + Box-Muller) to avoid materializing
    # x_noisy in HBM.
    noise = jax.random.normal(key, x.shape, x.dtype)
    x_noisy = x + noise
    return _gen_mlp_pallas(x_noisy, prepared_params, out_dim, tile_m, out_dtype)


# --------------------------------------------------------------------------
# Init + plain-JAX reference.
# --------------------------------------------------------------------------
def init_params(key, in_dim, num_pred, feat_shape):
    """Deterministic PyTorch-style (uniform +/- 1/sqrt(fan_in)) Linear init."""
    out_dim = num_pred * feat_shape
    dims = [(in_dim, 256), (256, 1024), (1024, out_dim)]
    params = {}
    keys = jax.random.split(key, 2 * len(dims))
    for idx, (fan_in, fan_out) in enumerate(dims):
        bound = 1.0 / jnp.sqrt(jnp.float32(fan_in))
        w = jax.random.uniform(keys[2 * idx], (fan_in, fan_out),
                               jnp.float32, -bound, bound)
        b = jax.random.uniform(keys[2 * idx + 1], (1, fan_out),
                               jnp.float32, -bound, bound)
        params[f"w{idx + 1}"] = w
        params[f"b{idx + 1}"] = b
    return params


def reference_forward(x, params, key):
    """Plain-JAX reference of the same math (eval-mode dropout)."""
    noise = jax.random.normal(key, x.shape, x.dtype)
    h = x + noise
    h = jnp.maximum(h @ params["w1"] + params["b1"], 0.0)
    h = jnp.maximum(h @ params["w2"] + params["b2"], 0.0)
    return jnp.tanh(h @ params["w3"] + params["b3"])


if __name__ == "__main__":
    # Small, module-consistent shapes.
    N = 64            # number of nodes
    IN_DIM = 32       # in_dim
    NUM_PRED = 5      # num_pred
    FEAT_SHAPE = 8    # feat_shape  -> output dim = 40 (padded to 128 inside)

    key = jax.random.PRNGKey(0)
    k_x, k_noise, k_param = jax.random.split(key, 3)

    x = jax.random.normal(k_x, (N, IN_DIM), dtype=jnp.float32)
    params = init_params(k_param, IN_DIM, NUM_PRED, FEAT_SHAPE)
    ref = reference_forward(x, params, k_noise)

    # Default path: bf16 MXU operands (f32 accumulation) — best on all chips.
    p_bf16, out_dim = prepare_params(params, matmul_dtype=jnp.bfloat16)
    out_bf16 = gen_forward(x, p_bf16, k_noise, out_dim)
    out_bf16 = jax.block_until_ready(out_bf16)
    assert out_bf16.shape == (N, NUM_PRED * FEAT_SHAPE)
    assert jnp.allclose(out_bf16, ref, atol=3e-2, rtol=3e-2), \
        "bf16 mismatch vs reference"

    # Exact f32-operand path: matches the plain-JAX reference tightly.
    p_f32, out_dim = prepare_params(params, matmul_dtype=jnp.float32)
    out_f32 = gen_forward(x, p_f32, k_noise, out_dim)
    out_f32 = jax.block_until_ready(out_f32)
    assert out_f32.shape == (N, NUM_PRED * FEAT_SHAPE)
    assert jnp.allclose(out_f32, ref, atol=1e-5, rtol=1e-5), \
        "f32 mismatch vs reference"

    print("KERNEL_OK")
</pallas_src>

<mosaic_0001>
module attributes {stable_mosaic.version = 11 : i64} {
  func.func @gen_mlp_kernel(%arg0: i32, %arg1: memref<32x32xbf16, #tpu.memory_space<vmem>>, %arg2: memref<32x256xbf16, #tpu.memory_space<vmem>>, %arg3: memref<1x256xf32, #tpu.memory_space<vmem>>, %arg4: memref<256x1024xbf16, #tpu.memory_space<vmem>>, %arg5: memref<1x1024xf32, #tpu.memory_space<vmem>>, %arg6: memref<1024x128xbf16, #tpu.memory_space<vmem>>, %arg7: memref<1x128xf32, #tpu.memory_space<vmem>>, %arg8: memref<32x128xf32, #tpu.memory_space<vmem>>) attributes {dimension_semantics = [#tpu.dimension_semantics<parallel>], iteration_bounds = array<i64: 2>, scalar_prefetch = 0 : i64, scratch_operands = 0 : i64, tpu.core_type = #tpu.core_type<tc>, window_params = [{transform_indices = @transform_0, window_bounds = array<i64: 32, 32>}, {pipeline_mode = #tpu.pipeline_mode<synchronous>, transform_indices = @transform_1, window_bounds = array<i64: 32, 256>}, {pipeline_mode = #tpu.pipeline_mode<synchronous>, transform_indices = @transform_2, window_bounds = array<i64: 1, 256>}, {pipeline_mode = #tpu.pipeline_mode<synchronous>, transform_indices = @transform_3, window_bounds = array<i64: 256, 1024>}, {pipeline_mode = #tpu.pipeline_mode<synchronous>, transform_indices = @transform_4, window_bounds = array<i64: 1, 1024>}, {pipeline_mode = #tpu.pipeline_mode<synchronous>, transform_indices = @transform_5, window_bounds = array<i64: 1024, 128>}, {pipeline_mode = #tpu.pipeline_mode<synchronous>, transform_indices = @transform_6, window_bounds = array<i64: 1, 128>}, {transform_indices = @transform_7, window_bounds = array<i64: 32, 128>}]} {
    %c0 = arith.constant 0 : index
    %c0_0 = arith.constant 0 : index
    %0 = vector.load %arg1[%c0, %c0_0] : memref<32x32xbf16, #tpu.memory_space<vmem>>, vector<32x32xbf16>
    %c0_1 = arith.constant 0 : index
    %c0_2 = arith.constant 0 : index
    %1 = vector.load %arg2[%c0_1, %c0_2] : memref<32x256xbf16, #tpu.memory_space<vmem>>, vector<32x256xbf16>
    %cst = arith.constant dense<0.000000e+00> : vector<32x256xf32>
    %2 = tpu.matmul %0, %1, %cst {dimension_numbers = #tpu.dot_dimension_numbers<[1], [0], [0], [1], [0, 0, 1, 1], [], []>} : vector<32x32xbf16>, vector<32x256xbf16>, vector<32x256xf32> -> vector<32x256xf32>
    %c0_3 = arith.constant 0 : index
    %c0_4 = arith.constant 0 : index
    %3 = vector.load %arg3[%c0_3, %c0_4] : memref<1x256xf32, #tpu.memory_space<vmem>>, vector<1x256xf32>
    %4 = vector.broadcast %3 : vector<1x256xf32> to vector<32x256xf32>
    %5 = arith.addf %2, %4 : vector<32x256xf32>
    %cst_5 = arith.constant 0.000000e+00 : f32
    %6 = vector.broadcast %cst_5 : f32 to vector<32x256xf32>
    %7 = arith.maximumf %5, %6 : vector<32x256xf32>
    %8 = arith.truncf %7 : vector<32x256xf32> to vector<32x256xbf16>
    %c0_6 = arith.constant 0 : index
    %c0_7 = arith.constant 0 : index
    %9 = vector.load %arg4[%c0_6, %c0_7] : memref<256x1024xbf16, #tpu.memory_space<vmem>>, vector<256x1024xbf16>
    %cst_8 = arith.constant dense<0.000000e+00> : vector<32x1024xf32>
    %10 = tpu.matmul %8, %9, %cst_8 {dimension_numbers = #tpu.dot_dimension_numbers<[1], [0], [0], [1], [0, 0, 1, 1], [], []>} : vector<32x256xbf16>, vector<256x1024xbf16>, vector<32x1024xf32> -> vector<32x1024xf32>
    %c0_9 = arith.constant 0 : index
    %c0_10 = arith.constant 0 : index
    %11 = vector.load %arg5[%c0_9, %c0_10] : memref<1x1024xf32, #tpu.memory_space<vmem>>, vector<1x1024xf32>
    %12 = vector.broadcast %11 : vector<1x1024xf32> to vector<32x1024xf32>
    %13 = arith.addf %10, %12 : vector<32x1024xf32>
    %cst_11 = arith.constant 0.000000e+00 : f32
    %14 = vector.broadcast %cst_11 : f32 to vector<32x1024xf32>
    %15 = arith.maximumf %13, %14 : vector<32x1024xf32>
    %16 = arith.truncf %15 : vector<32x1024xf32> to vector<32x1024xbf16>
    %c0_12 = arith.constant 0 : index
    %c0_13 = arith.constant 0 : index
    %17 = vector.load %arg6[%c0_12, %c0_13] : memref<1024x128xbf16, #tpu.memory_space<vmem>>, vector<1024x128xbf16>
    %cst_14 = arith.constant dense<0.000000e+00> : vector<32x128xf32>
    %18 = tpu.matmul %16, %17, %cst_14 {dimension_numbers = #tpu.dot_dimension_numbers<[1], [0], [0], [1], [0, 0, 1, 1], [], []>} : vector<32x1024xbf16>, vector<1024x128xbf16>, vector<32x128xf32> -> vector<32x128xf32>
    %c0_15 = arith.constant 0 : index
    %c0_16 = arith.constant 0 : index
    %19 = vector.load %arg7[%c0_15, %c0_16] : memref<1x128xf32, #tpu.memory_space<vmem>>, vector<1x128xf32>
    %20 = vector.broadcast %19 : vector<1x128xf32> to vector<32x128xf32>
    %21 = arith.addf %18, %20 : vector<32x128xf32>
    %22 = math.tanh %21 : vector<32x128xf32>
    %c0_17 = arith.constant 0 : index
    %c0_18 = arith.constant 0 : index
    %23 = vector.load %arg8[%c0_17, %c0_18] : memref<32x128xf32, #tpu.memory_space<vmem>>, vector<32x128xf32>
    tpu.vector_store %arg8[%c0_17, %c0_18], %22 {strides = array<i32>} : memref<32x128xf32, #tpu.memory_space<vmem>>, vector<32x128xf32>,
    return
  }
  func.func @transform_0(%arg0: i32) -> (i32, i32) {
    %c0_i32 = arith.constant 0 : i32
    %c0_i32_0 = arith.constant 0 : i32
    return %arg0, %c0_i32 : i32, i32
  }
  func.func @transform_1(%arg0: i32) -> (i32, i32) {
    %c0_i32 = arith.constant 0 : i32
    %c0_i32_0 = arith.constant 0 : i32
    %c0_i32_1 = arith.constant 0 : i32
    return %c0_i32, %c0_i32_0 : i32, i32
  }
  func.func @transform_2(%arg0: i32) -> (i32, i32) {
    %c0_i32 = arith.constant 0 : i32
    %c0_i32_0 = arith.constant 0 : i32
    %c0_i32_1 = arith.constant 0 : i32
    return %c0_i32, %c0_i32_0 : i32, i32
  }
  func.func @transform_3(%arg0: i32) -> (i32, i32) {
    %c0_i32 = arith.constant 0 : i32
    %c0_i32_0 = arith.constant 0 : i32
    %c0_i32_1 = arith.constant 0 : i32
    return %c0_i32, %c0_i32_0 : i32, i32
  }
  func.func @transform_4(%arg0: i32) -> (i32, i32) {
    %c0_i32 = arith.constant 0 : i32
    %c0_i32_0 = arith.constant 0 : i32
    %c0_i32_1 = arith.constant 0 : i32
    return %c0_i32, %c0_i32_0 : i32, i32
  }
  func.func @transform_5(%arg0: i32) -> (i32, i32) {
    %c0_i32 = arith.constant 0 : i32
    %c0_i32_0 = arith.constant 0 : i32
    %c0_i32_1 = arith.constant 0 : i32
    return %c0_i32, %c0_i32_0 : i32, i32
  }
  func.func @transform_6(%arg0: i32) -> (i32, i32) {
    %c0_i32 = arith.constant 0 : i32
    %c0_i32_0 = arith.constant 0 : i32
    %c0_i32_1 = arith.constant 0 : i32
    return %c0_i32, %c0_i32_0 : i32, i32
  }
  func.func @transform_7(%arg0: i32) -> (i32, i32) {
    %c0_i32 = arith.constant 0 : i32
    %c0_i32_0 = arith.constant 0 : i32
    return %arg0, %c0_i32 : i32, i32
  }
}

</mosaic_0001>

<bundles_post_ra>
// kernel: gen_forward.1
= control target key start
LH: loop header
LB: loop body
LE: loop exit
PB: predicated region body
PF: predicated region fallthrough
CT: control target
= control target key end

     0   :  { %12 = vsyncpa [#allocation3], 0  ;;  %s3040_s0 = inlined_call_operand.vmem [shape: bf16[64,32], index: 0, kind: input, shape index: {}]   ;;  %s3041_s1 = inlined_call_operand.vmem [shape: bf16[32,256], index: 1, kind: input, shape index: {}]   ;;  %s3042_s2 = inlined_call_operand.vmem [shape: f32[1,256], index: 2, kind: input, shape index: {}]   ;;  %s3043_s3 = inlined_call_operand.hbm [shape: bf16[256,1024], index: 3, kind: input, shape index: {}]   ;;  %s3044_s4 = inlined_call_operand.vmem [shape: f32[1,1024], index: 4, kind: input, shape index: {}]   ;;  %s3045_s5 = inlined_call_operand.hbm [shape: bf16[1024,128], index: 5, kind: input, shape index: {}]   ;;  %s3046_s6 = inlined_call_operand.vmem [shape: f32[1,128], index: 6, kind: input, shape index: {}]   ;;  %s3047_s7 = inlined_call_operand.vmem [shape: f32[64,128], index: 7, kind: output, shape index: {}]  }
   0x1   :  { %13 = vsyncpa [#allocation5], 0  ;;  %s2867_s24 = smov 0  }
   0x2 LB: > { %s2820_s25 = smov [#allocation2]   ;;  %s2306_s27 = sadd.s32 4294967295, %s2818_s24   ;;  %s2818_s24 = sphi %s2867_s24, %s19_s24  }
   0x3   : > { %s220_s26 = sshll.u32 %s2820_s25, 4  ;;  %p2308_p0 = scmp.ge.s32.totalorder %s2818_s24, 1  ;;  %s221_s26 = int_to_ptr.vmem [resolvable:$true] %s220_s26 }
   0x4   : > { %p202_p1 = scmp.lt.s32.totalorder %s2818_s24, 3  ;;  %p2881_p3 = scmp.eq.s32.totalorder %s2306_s27, 0 }
   0x5   : > { %s2821_s30 = smov [#allocation4]   ;;  %s2748_s12 = scalar_lea.hbm %s3043_s3, 16384 }
   0x6   : > { %p2875_p2 = pnand %p2308_p0, %p202_p1  ;;  %s236_s8 = sshll.u32 %s2821_s30, 4  ;;  %s2893_s8 = int_to_ptr.vmem [resolvable:$true] %s236_s8 }
   0x7   : > { %s3052_s29 = scalar_select %p2881_p3, 1, 0 }
   0x8   : > { %s3051_s28 = scalar_select %p2875_p2, 1, 0 }
   0x9   : > { %p2642_p4 = pneg %p2875_p2  ;;  %p2749_p6 = scmp.ne.s32.totalorder %s3043_s3, %s2748_s12 }
   0xa   : > { %p2755_p10 = scmp.lt.u32.totalorder %s2748_s12, %s3043_s3 }
   0xb   : > { %p2889_p5 = pnand %p2881_p3, %p2642_p4 }
   0xd   : > { %p2750_p7 = pneg %p2889_p5 }
   0xf   : > { %p2751_p8 = pnand %p2750_p7, %p2749_p6 }
  0x11   : > { %p2752_p9 = pneg %p2751_p8 }
  0x13   : > { %p2757_p11 = pnand %p2755_p10, %p2752_p9 }
  0x15   : > { %2760 = shalt.err (!%p2757_p11)
}
  0x16   : > { %s2761_s17 = scalar_lea.vmem %s221_s26, 16384  ;;  %p2769_p1 = scmp.lt.s32.totalorder %s221_s26, %s221_s26 }
  0x17   : > { %p2762_p12 = scmp.ne.s32.totalorder %s221_s26, %s2761_s17  ;;  %p2770_p4 = scmp.lt.s32.totalorder %s2761_s17, %s2761_s17 }
  0x19   : > { %p2764_p13 = pnand %p2762_p12, %p2750_p7  ;;  %p2771_p3 = por %p2770_p4, %p2769_p1 }
  0x1b   : > { %p2765_p0 = pneg %p2764_p13 }
  0x1d   : > { %p2772_p2 = pnand %p2771_p3, %p2765_p0 }
  0x1f   : > { %2775 = shalt.err (!%p2772_p2)
}
  0x20   : > { %s2822_s18 = smov 512   ;;  %s2823_s19 = smov 32  }
  0x21   : > { %2645 = dma.hbm_to_vmem [thread:$0]  (!%p2889_p5), %s3043_s3, 16384, %s221_s26, [#allocation3], %s2822_s18, %s2822_s18, %s2823_s19  }
  0x22   : > { %s2776_s25 = scalar_lea.hbm %s3045_s5, 8192 }
  0x23   : > { %p2777_p6 = scmp.ne.s32.totalorder %s3045_s5, %s2776_s25  ;;  %p2783_p8 = scmp.lt.u32.totalorder %s2776_s25, %s3045_s5 }
  0x25   : > { %p2779_p2 = pnand %p2777_p6, %p2750_p7 }
  0x27   : > { %p2780_p3 = pneg %p2779_p2 }
  0x29   : > { %p2785_p9 = pnand %p2783_p8, %p2780_p3 }
  0x2b   : > { %2788 = shalt.err (!%p2785_p9)
}
  0x2c   : > { %s2789_s26 = scalar_lea.vmem %s2893_s8, 8192  ;;  %p2797_p13 = scmp.lt.s32.totalorder %s2893_s8, %s2893_s8 }
  0x2d   : > { %p2790_p10 = scmp.ne.s32.totalorder %s2893_s8, %s2789_s26  ;;  %p2798_p0 = scmp.lt.s32.totalorder %s2789_s26, %s2789_s26 }
  0x2f   : > { %p2792_p11 = pnand %p2790_p10, %p2750_p7  ;;  %p2799_p1 = por %p2798_p0, %p2797_p13 }
  0x31   : > { %p2793_p12 = pneg %p2792_p11 }
  0x33   : > { %p2800_p4 = pnand %p2799_p1, %p2793_p12 }
  0x35   : > { %2803 = shalt.err (!%p2800_p4)
}
  0x36   : > { %s2824_s13 = smov 64   ;;  %s2825_s14 = smov 4  }
  0x37   : > { %2648 = dma.hbm_to_vmem [thread:$0]  (!%p2889_p5), %s3045_s5, 8192, %s2893_s8, [#allocation5], %s2824_s13, %s2824_s13, %s2825_s14  }
  0x38   : > { %p3054_p6 = scmp.ne.s32.totalorder %s3051_s28, 0 }
  0x39   : > { %p3055_p7 = scmp.ne.s32.totalorder (!%p3054_p6), %s3052_s29, 0 }
  0x3a   : > { %264 = sbr.rel (%p3054_p6) target bundleno = 826 (0x33a), region = 48 }
  0x41   : > { %2809 = dma.done.wait (%p3055_p7), [#allocation3], 16384  }
  0x42   : > { %2811 = vsyncadd (%p3055_p7), [#allocation3], 4294950912 }
  0x43   : > { %2813 = dma.done.wait (%p3055_p7), [#allocation5], 8192  }
  0x44   : > { %2815 = vsyncadd (%p3055_p7), [#allocation5], 4294959104  ;;  %s2315_s9 = sshll.u32 %s2306_s27, 2  ;;  %v2826_v0 = vmov 0   ;;  %v2668_v1 = vld [vmem:[%s3041_s1 + $0x4] ss:$8 sps:$4 sm:$0xff]  }
  0x45   : > { %402 = vmatprep.mubr.bf16.mxu0 %v2826_v0  ;;  %p301_p5 = scmp.lt.s32.totalorder %s2315_s9, 7  ;;  %v2670_v2 = vld [vmem:[%s3041_s1] ss:$8 sps:$4 sm:$0xff]   ;;  %370 = vmatprep.subr.bf16.mxu0 %v2668_v1  ;;  %v2671_v3 = vld [vmem:[%s3041_s1 + $0x14] ss:$8 sps:$4 sm:$0xff]   ;;  %vm363_vm0 = vcmask 261120  }
  0x46   : > { %371 = vmatpush1.bf16.msra.mxu0 %v2670_v2  ;;  %v2673_v4 = vld [vmem:[%s3041_s1 + $0x10] ss:$8 sps:$4 sm:$0xff]   ;;  %v435_v6 = vld [vmem:[#allocation2] sm:$0xff]  ;;  %v436_v8 = vld [vmem:[#allocation2 + $0x8] sm:$0xff] }
  0x47   : > { %s3057_s9 = smov (!%p301_p5, %s2315_s9), 7  ;;  %372 = vmatprep.subr.bf16.mxu0 %v2671_v3  ;;  %v439_v7 = vld [vmem:[#allocation2 + $0x20] sm:$0xff]  ;;  %v440_v9 = vld [vmem:[#allocation2 + $0x28] sm:$0xff] }
  0x48   : > { %s2316_s28 = sshll.u32 %s3057_s9, 2  ;;  %v2328_v10 = vcombine.high %v435_v6, %v439_v7  ;;  %v2330_v11 = vcombine.high %v436_v8, %v440_v9  ;;  %v2327_v12 = vcombine.low %v435_v6, %v439_v7  ;;  %v443_v13 = vld [vmem:[#allocation2 + $0x40] sm:$0xff]  ;;  %v444_v15 = vld [vmem:[#allocation2 + $0x48] sm:$0xff]  ;;  %v2329_v16 = vcombine.low %v436_v8, %v440_v9  ;;  %s2318_s14 = sshll.u32 %s3057_s9, 3 }
  0x49   : > { %s2966_s21 = scalar_lea.vmem %s3040_s0, %s2316_s28  ;;  %v447_v14 = vld [vmem:[#allocation2 + $0x60] sm:$0xff]  ;;  %v448_v18 = vld [vmem:[#allocation2 + $0x68] sm:$0xff]  ;;  %s310_s28 = scalar_lea.vmem %s3047_s7, %s2318_s14 }
  0x4a   : > { %v2674_v5 = vld [vmem:[%s2966_s21] sm:$0xff]   ;;  %373 = vmatpush1.bf16.msra.mxu0 %v2673_v4  ;;  %v2336_v17 = vcombine.high %v443_v13, %v447_v14  ;;  %1245 = vmatprep.subr.bf16.mxu1 %v2328_v10  ;;  %v2338_v21 = vcombine.high %v444_v15, %v448_v18  ;;  %v2335_v22 = vcombine.low %v443_v13, %v447_v14  ;;  %v452_v23 = vld [vmem:[#allocation2 + $0x88] sm:$0xff] }
  0x4b   : > { %v451_v19 = vld [vmem:[#allocation2 + $0x80] sm:$0xff]  ;;  %1298 = vmatprep.subr.bf16.mxu0 %v2330_v11  ;;  %1246 = vmatpush1.bf16.msra.mxu1 %v2327_v12  ;;  %v456_v24 = vld [vmem:[#allocation2 + $0xa8] sm:$0xff]  ;;  %v2337_v26 = vcombine.low %v444_v15, %v448_v18 }
  0x4c   : > { %v455_v20 = vld [vmem:[#allocation2 + $0xa0] sm:$0xff]  ;;  %1247 = vmatprep.subr.bf16.mxu1 %v2336_v17  ;;  %v2346_v29 = vcombine.high %v452_v23, %v456_v24  ;;  %v460_v31 = vld [vmem:[#allocation2 + $0xc8] sm:$0xff]  ;;  %v2345_v35 = vcombine.low %v452_v23, %v456_v24 }
  0x4d   : > { %2325 = vmatmul.mubr.msk.bf16.vlgmr.msra.gmra.mrb[0].mxu0 %vm363_vm0, %v2674_v5  ;;  %v2344_v25 = vcombine.high %v451_v19, %v455_v20  ;;  %v459_v27 = vld [vmem:[#allocation2 + $0xc0] sm:$0xff]  ;;  %v2343_v30 = vcombine.low %v451_v19, %v455_v20  ;;  %v464_v32 = vld [vmem:[#allocation2 + $0xe8] sm:$0xff] }
  0x4e   : > { %412 = vmatprep.mubr.bf16.mxu0 %v2826_v0  ;;  %1299 = vmatpush1.bf16.msra.mxu0 %v2329_v16  ;;  %v463_v28 = vld [vmem:[#allocation2 + $0xe0] sm:$0xff]  ;;  %v2675_v33 = vld [vmem:[%s2966_s21 + $0x8] sm:$0xff]   ;;  %v2354_v38 = vcombine.high %v460_v31, %v464_v32  ;;  %v2353_v43 = vcombine.low %v460_v31, %v464_v32 }
  0x4f   : > { %1300 = vmatprep.subr.bf16.mxu0 %v2338_v21  ;;  %1248 = vmatpush1.bf16.msra.mxu1 %v2335_v22  ;;  %v2352_v34 = vcombine.high %v459_v27, %v463_v28  ;;  %v467_v36 = vld [vmem:[#allocation2 + $0x100] sm:$0xff]  ;;  %v2351_v39 = vcombine.low %v459_v27, %v463_v28  ;;  %v468_v40 = vld [vmem:[#allocation2 + $0x108] sm:$0xff] }
  0x50   : > { %1249 = vmatprep.subr.bf16.mxu1 %v2344_v25  ;;  %v471_v37 = vld [vmem:[#allocation2 + $0x120] sm:$0xff]  ;;  %v472_v41 = vld [vmem:[#allocation2 + $0x128] sm:$0xff] }
  0x51   : > { %v2360_v42 = vcombine.high %v467_v36, %v471_v37  ;;  %v475_v44 = vld [vmem:[#allocation2 + $0x140] sm:$0xff]  ;;  %v2362_v46 = vcombine.high %v468_v40, %v472_v41  ;;  %v2359_v47 = vcombine.low %v467_v36, %v471_v37  ;;  %v476_v48 = vld [vmem:[#allocation2 + $0x148] sm:$0xff]  ;;  %v2361_v53 = vcombine.low %v468_v40, %v472_v41 }
  0x52   : > { %1301 = vmatpush1.bf16.msra.mxu0 %v2337_v26  ;;  %v479_v45 = vld [vmem:[#allocation2 + $0x160] sm:$0xff]  ;;  %v480_v49 = vld [vmem:[#allocation2 + $0x168] sm:$0xff] }
  0x53   : > { %1302 = vmatprep.subr.bf16.mxu0 %v2346_v29  ;;  %1250 = vmatpush1.bf16.msra.mxu1 %v2343_v30  ;;  %v2368_v50 = vcombine.high %v475_v44, %v479_v45  ;;  %v483_v51 = vld [vmem:[#allocation2 + $0x180] sm:$0xff]  ;;  %v484_v54 = vld [vmem:[#allocation2 + $0x188] sm:$0xff]  ;;  %v2370_v56 = vcombine.high %v476_v48, %v480_v49  ;;  %v2367_v57 = vcombine.low %v475_v44, %v479_v45 }
  0x54   : > { %1251 = vmatprep.subr.bf16.mxu1 %v2352_v34  ;;  %v487_v52 = vld [vmem:[#allocation2 + $0x1a0] sm:$0xff]  ;;  %v488_v55 = vld [vmem:[#allocation2 + $0x1a8] sm:$0xff]  ;;  %v2369_v61 = vcombine.low %v476_v48, %v480_v49 }
  0x55   : > { %2326 = vmatmul.mubr.msk.bf16.gmra.mrb[4].mxu0 %vm363_vm0, %v2675_v33  ;;  %v491_v58 = vld [vmem:[#allocation2 + $0x1c0] sm:$0xff]  ;;  %v2376_v60 = vcombine.high %v483_v51, %v487_v52  ;;  %v492_v62 = vld [vmem:[#allocation2 + $0x1c8] sm:$0xff]  ;;  %v2378_v0 = vcombine.high %v484_v54, %v488_v55  ;;  %v2375_v1 = vcombine.low %v483_v51, %v487_v52  ;;  %v2377_v5 = vcombine.low %v484_v54, %v488_v55 }
  0x56   : > { %1303 = vmatpush1.bf16.msra.mxu0 %v2345_v35  ;;  %v495_v59 = vld [vmem:[#allocation2 + $0x1e0] sm:$0xff]  ;;  %v496_v63 = vld [vmem:[#allocation2 + $0x1e8] sm:$0xff] }
  0x57   : > { %1304 = vmatprep.subr.bf16.mxu0 %v2354_v38  ;;  %1252 = vmatpush1.bf16.msra.mxu1 %v2351_v39  ;;  %v499_v2 = vld [vmem:[#allocation2 + $0x200] sm:$0xff]  ;;  %v2384_v4 = vcombine.high %v491_v58, %v495_v59  ;;  %v500_v6 = vld [vmem:[#allocation2 + $0x208] sm:$0xff]  ;;  %v2386_v8 = vcombine.high %v492_v62, %v496_v63  ;;  %v2383_v9 = vcombine.low %v491_v58, %v495_v59 }
  0x58   : > { %1253 = vmatprep.subr.bf16.mxu1 %v2360_v42  ;;  %v503_v3 = vld [vmem:[#allocation2 + $0x220] sm:$0xff]  ;;  %v504_v7 = vld [vmem:[#allocation2 + $0x228] sm:$0xff]  ;;  %v2385_v13 = vcombine.low %v492_v62, %v496_v63 }
  0x59   : > { %v507_v10 = vld [vmem:[#allocation2 + $0x240] sm:$0xff]  ;;  %v2392_v12 = vcombine.high %v499_v2, %v503_v3  ;;  %v508_v14 = vld [vmem:[#allocation2 + $0x248] sm:$0xff]  ;;  %v2394_v16 = vcombine.high %v500_v6, %v504_v7  ;;  %v2391_v17 = vcombine.low %v499_v2, %v503_v3  ;;  %v2393_v21 = vcombine.low %v500_v6, %v504_v7  ;;  %v437_v7 = vld [vmem:[#allocation2 + $0x10] sm:$0xff] }
  0x5a   : > { %1305 = vmatpush1.bf16.msra.mxu0 %v2353_v43  ;;  %v511_v11 = vld [vmem:[#allocation2 + $0x260] sm:$0xff]  ;;  %v512_v15 = vld [vmem:[#allocation2 + $0x268] sm:$0xff] }
  0x5b   : > { %1306 = vmatprep.subr.bf16.mxu0 %v2362_v46  ;;  %1254 = vmatpush1.bf16.msra.mxu1 %v2359_v47  ;;  %v515_v18 = vld [vmem:[#allocation2 + $0x280] sm:$0xff]  ;;  %v2400_v20 = vcombine.high %v507_v10, %v511_v11  ;;  %v516_v22 = vld [vmem:[#allocation2 + $0x288] sm:$0xff]  ;;  %v2402_v24 = vcombine.high %v508_v14, %v512_v15  ;;  %v2399_v25 = vcombine.low %v507_v10, %v511_v11  ;;  %v442_v11 = vld [vmem:[#allocation2 + $0x38] sm:$0xff] }
  0x5c   : > { %1255 = vmatprep.subr.bf16.mxu1 %v2368_v50  ;;  %v519_v19 = vld [vmem:[#allocation2 + $0x2a0] sm:$0xff]  ;;  %v520_v23 = vld [vmem:[#allocation2 + $0x2a8] sm:$0xff]  ;;  %v2401_v29 = vcombine.low %v508_v14, %v512_v15  ;;  %v323_v15 = vlaneseq }
  0x5d   : > { %v523_v26 = vld [vmem:[#allocation2 + $0x2c0] sm:$0xff]  ;;  %v2408_v28 = vcombine.high %v515_v18, %v519_v19  ;;  %v524_v30 = vld [vmem:[#allocation2 + $0x2c8] sm:$0xff]  ;;  %v2410_v32 = vcombine.high %v516_v22, %v520_v23  ;;  %v2407_v33 = vcombine.low %v515_v18, %v519_v19  ;;  %v2409_v37 = vcombine.low %v516_v22, %v520_v23 }
  0x5e   : > { %1307 = vmatpush1.bf16.msra.mxu0 %v2361_v53  ;;  %v527_v27 = vld [vmem:[#allocation2 + $0x2e0] sm:$0xff]  ;;  %v528_v31 = vld [vmem:[#allocation2 + $0x2e8] sm:$0xff] }
  0x5f   : > { %1308 = vmatprep.subr.bf16.mxu0 %v2370_v56  ;;  %1256 = vmatpush1.bf16.msra.mxu1 %v2367_v57  ;;  %v531_v34 = vld [vmem:[#allocation2 + $0x300] sm:$0xff]  ;;  %v2416_v36 = vcombine.high %v523_v26, %v527_v27  ;;  %v532_v38 = vld [vmem:[#allocation2 + $0x308] sm:$0xff]  ;;  %v2418_v40 = vcombine.high %v524_v30, %v528_v31  ;;  %v2415_v41 = vcombine.low %v523_v26, %v527_v27 }
  0x60   : > { %1257 = vmatprep.subr.bf16.mxu1 %v2376_v60  ;;  %v535_v35 = vld [vmem:[#allocation2 + $0x320] sm:$0xff]  ;;  %v536_v39 = vld [vmem:[#allocation2 + $0x328] sm:$0xff]  ;;  %v2417_v45 = vcombine.low %v524_v30, %v528_v31 }
  0x61   : > { %v539_v42 = vld [vmem:[#allocation2 + $0x340] sm:$0xff]  ;;  %v2424_v44 = vcombine.high %v531_v34, %v535_v35  ;;  %v540_v46 = vld [vmem:[#allocation2 + $0x348] sm:$0xff]  ;;  %v2426_v48 = vcombine.high %v532_v38, %v536_v39  ;;  %v2423_v49 = vcombine.low %v531_v34, %v535_v35  ;;  %v2425_v51 = vcombine.low %v532_v38, %v536_v39  ;;  %v449_v35 = vld [vmem:[#allocation2 + $0x70] sm:$0xff] }
  0x62   : > { %1309 = vmatpush1.bf16.msra.mxu0 %v2369_v61  ;;  %v543_v43 = vld [vmem:[#allocation2 + $0x360] sm:$0xff]  ;;  %v544_v47 = vld [vmem:[#allocation2 + $0x368] sm:$0xff] }
  0x63   : > { %1310 = vmatprep.subr.bf16.mxu0 %v2378_v0  ;;  %1258 = vmatpush1.bf16.msra.mxu1 %v2375_v1  ;;  %v2432_v50 = vcombine.high %v539_v42, %v543_v43  ;;  %v2434_v52 = vcombine.high %v540_v46, %v544_v47  ;;  %v2431_v53 = vcombine.low %v539_v42, %v543_v43  ;;  %v547_v55 = vld [vmem:[#allocation2 + $0x380] sm:$0xff]  ;;  %v548_v57 = vld [vmem:[#allocation2 + $0x388] sm:$0xff] }
  0x64   : > { %1259 = vmatprep.subr.bf16.mxu1 %v2384_v4  ;;  %v2433_v54 = vcombine.low %v540_v46, %v544_v47  ;;  %v551_v56 = vld [vmem:[#allocation2 + $0x3a0] sm:$0xff]  ;;  %v552_v59 = vld [vmem:[#allocation2 + $0x3a8] sm:$0xff] }
  0x65   : > { %v2440_v58 = vcombine.high %v547_v55, %v551_v56  ;;  %v2441_v60 = vcombine.low %v548_v57, %v552_v59  ;;  %v2442_v61 = vcombine.high %v548_v57, %v552_v59  ;;  %v2439_v62 = vcombine.low %v547_v55, %v551_v56  ;;  %v555_v63 = vld [vmem:[#allocation2 + $0x3c0] sm:$0xff]  ;;  %v556_v1 = vld [vmem:[#allocation2 + $0x3c8] sm:$0xff] }
  0x66   : > { %1311 = vmatpush1.bf16.msra.mxu0 %v2377_v5  ;;  %v559_v0 = vld [vmem:[#allocation2 + $0x3e0] sm:$0xff]  ;;  %v560_v3 = vld [vmem:[#allocation2 + $0x3e8] sm:$0xff] }
  0x67   : > { %1312 = vmatprep.subr.bf16.mxu0 %v2386_v8  ;;  %1260 = vmatpush1.bf16.msra.mxu1 %v2383_v9  ;;  %v2448_v2 = vcombine.high %v555_v63, %v559_v0  ;;  %v2449_v4 = vcombine.low %v556_v1, %v560_v3  ;;  %v2450_v5 = vcombine.high %v556_v1, %v560_v3  ;;  %v441_v8 = vld [vmem:[#allocation2 + $0x30] sm:$0xff]  ;;  %v438_v9 = vld [vmem:[#allocation2 + $0x18] sm:$0xff]  ;;  %v321_v18 = vld [vmem:[%s3042_s2] sm:$0x3] }
  0x68   : > { %1261 = vmatprep.subr.bf16.mxu1 %v2392_v12  ;;  %v2447_v6 = vcombine.low %v555_v63, %v559_v0  ;;  %v2332_v10 = vcombine.high %v437_v7, %v441_v8  ;;  %v2331_v12 = vcombine.low %v437_v7, %v441_v8  ;;  %v2334_v14 = vcombine.high %v438_v9, %v442_v11  ;;  %v465_v0 = vld [vmem:[#allocation2 + $0xf0] sm:$0xff]  ;;  %v462_v1 = vld [vmem:[#allocation2 + $0xd8] sm:$0xff] }
  0x6a   : > { %1313 = vmatpush1.bf16.msra.mxu0 %v2385_v13  ;;  %v2333_v13 = vcombine.low %v438_v9, %v442_v11  ;;  %v473_v9 = vld [vmem:[#allocation2 + $0x130] sm:$0xff]  ;;  %v474_v11 = vld [vmem:[#allocation2 + $0x138] sm:$0xff] }
  0x6b   : > { %1314 = vmatprep.subr.bf16.mxu0 %v2394_v16  ;;  %1262 = vmatpush1.bf16.msra.mxu1 %v2391_v17  ;;  %v2978_v16 = vshrl.u32 %v323_v15, 7 }
  0x6c   : > { %1263 = vmatprep.subr.bf16.mxu1 %v2400_v20 }
  0x6d   : > { %v325_v17 = vsub.s32 0, %v2978_v16  ;;  %v329_v19 = vsub.s32 1, %v2978_v16 }
  0x6e   : > { %1315 = vmatpush1.bf16.msra.mxu0 %v2393_v21 }
  0x6f   : > { %1316 = vmatprep.subr.bf16.mxu0 %v2402_v24  ;;  %1264 = vmatpush1.bf16.msra.mxu1 %v2399_v25  ;;  %v326_v20 = vrot.slane %v321_v18, %v325_v17  ;;  %v330_v21 = vrot.slane %v321_v18, %v329_v19  ;;  %v477_v18 = vld [vmem:[#allocation2 + $0x150] sm:$0xff] }
  0x70   : > { %1265 = vmatprep.subr.bf16.mxu1 %v2408_v28 }
  0x72   : > { %1317 = vmatpush1.bf16.msra.mxu0 %v2401_v29 }
  0x73   : > { %1318 = vmatprep.subr.bf16.mxu0 %v2410_v32  ;;  %1266 = vmatpush1.bf16.msra.mxu1 %v2407_v33  ;;  %v445_v32 = vld [vmem:[#allocation2 + $0x50] sm:$0xff] }
  0x74   : > { %1267 = vmatprep.subr.bf16.mxu1 %v2416_v36  ;;  %v446_v36 = vld [vmem:[#allocation2 + $0x58] sm:$0xff]  ;;  %v2340_v43 = vcombine.high %v445_v32, %v449_v35  ;;  %v2339_v56 = vcombine.low %v445_v32, %v449_v35  ;;  %v493_v35 = vld [vmem:[#allocation2 + $0x1d0] sm:$0xff] }
  0x76   : > { %1319 = vmatpush1.bf16.msra.mxu0 %v2409_v37  ;;  %v450_v37 = vld [vmem:[#allocation2 + $0x78] sm:$0xff] }
  0x77   : > { %1320 = vmatprep.subr.bf16.mxu0 %v2418_v40  ;;  %1268 = vmatpush1.bf16.msra.mxu1 %v2415_v41  ;;  %v2341_v57 = vcombine.low %v446_v36, %v450_v37 }
  0x78   : > { %1269 = vmatprep.subr.bf16.mxu1 %v2424_v44  ;;  %v2342_v44 = vcombine.high %v446_v36, %v450_v37  ;;  %v497_v36 = vld [vmem:[#allocation2 + $0x1f0] sm:$0xff]  ;;  %v494_v37 = vld [vmem:[#allocation2 + $0x1d8] sm:$0xff] }
  0x7a   : > { %1321 = vmatpush1.bf16.msra.mxu0 %v2417_v45  ;;  %v453_v45 = vld [vmem:[#allocation2 + $0x90] sm:$0xff] }
  0x7b   : > { %1322 = vmatprep.subr.bf16.mxu0 %v2426_v48  ;;  %1270 = vmatpush1.bf16.msra.mxu1 %v2423_v49  ;;  %v457_v48 = vld [vmem:[#allocation2 + $0xb0] sm:$0xff]  ;;  %v454_v49 = vld [vmem:[#allocation2 + $0x98] sm:$0xff] }
  0x7c   : > { %1271 = vmatprep.subr.bf16.mxu1 %v2432_v50  ;;  %v458_v50 = vld [vmem:[#allocation2 + $0xb8] sm:$0xff]  ;;  %v2348_v59 = vcombine.high %v453_v45, %v457_v48 }
  0x7e   : > { %1323 = vmatpush1.bf16.msra.mxu0 %v2425_v51 }
  0x7f   : > { %1324 = vmatprep.subr.bf16.mxu0 %v2434_v52  ;;  %1272 = vmatpush1.bf16.msra.mxu1 %v2431_v53 }
  0x80   : > { %1273 = vmatprep.subr.bf16.mxu1 %v2440_v58 }
  0x82   : > { %1325 = vmatpush1.bf16.msra.mxu0 %v2433_v54 }
  0x83   : > { %1326 = vmatprep.subr.bf16.mxu0 %v2442_v61  ;;  %1274 = vmatpush1.bf16.msra.mxu1 %v2439_v62  ;;  %v461_v62 = vld [vmem:[#allocation2 + $0xd0] sm:$0xff] }
  0x84   : > { %1275 = vmatprep.subr.bf16.mxu1 %v2448_v2  ;;  %v466_v2 = vld [vmem:[#allocation2 + $0xf8] sm:$0xff]  ;;  %v2356_v7 = vcombine.high %v461_v62, %v465_v0 }
  0x85   : > { %v2358_v8 = vcombine.high %v462_v1, %v466_v2 }
  0x86   : > { %1327 = vmatpush1.bf16.msra.mxu0 %v2441_v60  ;;  %v2350_v60 = vcombine.high %v454_v49, %v458_v50 }
  0x87   : > { %1328 = vmatprep.subr.bf16.mxu0 %v2450_v5  ;;  %1276 = vmatpush1.bf16.msra.mxu1 %v2447_v6  ;;  %v2349_v5 = vcombine.low %v454_v49, %v458_v50  ;;  %v469_v6 = vld [vmem:[#allocation2 + $0x110] sm:$0xff] }
  0x88   : > { %1351 = vmatprep.subr.bf16.mxu1 %v2332_v10  ;;  %v470_v10 = vld [vmem:[#allocation2 + $0x118] sm:$0xff] }
  0x89   : > { %v2366_v15 = vcombine.high %v470_v10, %v474_v11 }
  0x8a   : > { %1329 = vmatpush1.bf16.msra.mxu0 %v2449_v4  ;;  %v2347_v4 = vcombine.low %v453_v45, %v457_v48  ;;  %v505_v45 = vld [vmem:[#allocation2 + $0x230] sm:$0xff]  ;;  %v2387_v48 = vcombine.low %v493_v35, %v497_v36 }
  0x8b   : > { %1404 = vmatprep.subr.bf16.mxu0 %v2334_v14  ;;  %v2364_v14 = vcombine.high %v469_v6, %v473_v9 }
 0x120   : > { %v404_v22 = vpop.f32.mrb[0].mxu0 }
 0x121   : > { %v405_v23 = vadd.f32 %v404_v22, %v326_v20  ;;  %v406_v24 = vpop.f32.mrb[1].mxu0  ;;  %v482_v22 = vld [vmem:[#allocation2 + $0x178] sm:$0xff] }
 0x122   : > { %v407_v25 = vadd.f32 %v406_v24, %v330_v21  ;;  %v408_v26 = vpop.f32.mrb[2].mxu0  ;;  %v2365_v24 = vcombine.low %v470_v10, %v474_v11 }
 0x123   : > { %v409_v27 = vadd.f32 %v408_v26, %v326_v20  ;;  %v410_v28 = vpop.f32.mrb[3].mxu0  ;;  %v423_v30 = vmax.f32 %v405_v23, 0.0  ;;  %v2363_v23 = vcombine.low %v469_v6, %v473_v9  ;;  %v525_v6 = vld [vmem:[#allocation2 + $0x2d0] sm:$0xff]  ;;  %v530_v9 = vld [vmem:[#allocation2 + $0x2f8] sm:$0xff] }
 0x124   : > { %v411_v29 = vadd.f32 %v410_v28, %v330_v21  ;;  %v424_v33 = vmax.f32 %v407_v25, 0.0  ;;  %v489_v28 = vld [vmem:[#allocation2 + $0x1b0] sm:$0xff] }
 0x125   : > { %v425_v31 = vmax.f32 %v409_v27, 0.0  ;;  %v485_v27 = vld [vmem:[#allocation2 + $0x190] sm:$0xff] }
 0x126   : > { %v426_v34 = vmax.f32 %v411_v29, 0.0  ;;  %v486_v29 = vld [vmem:[#allocation2 + $0x198] sm:$0xff] }
 0x127   : > { %v2989_v38 = vpack.c.bf16 %v425_v31, %v423_v30  ;;  %v490_v30 = vld [vmem:[#allocation2 + $0x1b8] sm:$0xff] }
 0x128   : > { %v432_v39 = vpack.c.bf16 %v426_v34, %v424_v33  ;;  %v414_v40 = vpop.f32.mrb[4].mxu0  ;;  %v2380_v33 = vcombine.high %v485_v27, %v489_v28  ;;  %v2382_v34 = vcombine.high %v486_v29, %v490_v30 }
 0x129   : > { %v415_v41 = vadd.f32 %v414_v40, %v326_v20  ;;  %v416_v42 = vpop.f32.mrb[5].mxu0  ;;  %v2379_v40 = vcombine.low %v485_v27, %v489_v28  ;;  %v542_v27 = vld [vmem:[#allocation2 + $0x358] sm:$0xff] }
 0x12a   : > { %v417_v46 = vadd.f32 %v416_v42, %v330_v21  ;;  %v418_v47 = vpop.f32.mrb[6].mxu0  ;;  %1277 = vmatprep.mubr.bf16.mxu1 %v432_v39  ;;  %1330 = vmatprep.mubr.bf16.mxu0 %v432_v39  ;;  %v2388_v42 = vcombine.high %v493_v35, %v497_v36  ;;  %v546_v28 = vld [vmem:[#allocation2 + $0x378] sm:$0xff] }
 0x12b   : > { %v427_v51 = vmax.f32 %v415_v41, 0.0  ;;  %v419_v52 = vadd.f32 %v418_v47, %v326_v20  ;;  %v420_v53 = vpop.f32.mrb[7].mxu0  ;;  %1278 = vmatmul.mubr.bf16.vlgmr.msra.gmra.mrb[0].mxu1 %v2989_v38  ;;  %1331 = vmatmul.mubr.bf16.vlgmr.msra.gmra.mrb[8].mxu0 %v2989_v38  ;;  %v481_v20 = vld [vmem:[#allocation2 + $0x170] sm:$0xff]  ;;  %v2381_v41 = vcombine.low %v486_v29, %v490_v30  ;;  %v506_v47 = vld [vmem:[#allocation2 + $0x238] sm:$0xff] }
 0x12c   : > { %v428_v54 = vmax.f32 %v417_v46, 0.0  ;;  %v421_v55 = vadd.f32 %v420_v53, %v330_v21  ;;  %1352 = vmatpush1.bf16.msra.mxu1 %v2331_v12  ;;  %1405 = vmatpush1.bf16.msra.mxu0 %v2333_v13  ;;  %v2355_v12 = vcombine.low %v461_v62, %v465_v0  ;;  %v2357_v13 = vcombine.low %v462_v1, %v466_v2  ;;  %v478_v21 = vld [vmem:[#allocation2 + $0x158] sm:$0xff]  ;;  %v513_v53 = vld [vmem:[#allocation2 + $0x270] sm:$0xff] }
 0x12d   : > { %v429_v58 = vmax.f32 %v419_v52, 0.0  ;;  %1353 = vmatprep.subr.bf16.mxu1 %v2340_v43  ;;  %1406 = vmatprep.subr.bf16.mxu0 %v2342_v44  ;;  %v2372_v25 = vcombine.high %v477_v18, %v481_v20  ;;  %v2374_v26 = vcombine.high %v478_v21, %v482_v22  ;;  %v2371_v31 = vcombine.low %v477_v18, %v481_v20  ;;  %v501_v44 = vld [vmem:[#allocation2 + $0x210] sm:$0xff]  ;;  %v502_v46 = vld [vmem:[#allocation2 + $0x218] sm:$0xff] }
 0x12e   : > { %v430_v61 = vmax.f32 %v421_v55, 0.0  ;;  %v2373_v32 = vcombine.low %v478_v21, %v482_v22  ;;  %v2396_v50 = vcombine.high %v501_v44, %v505_v45  ;;  %v509_v52 = vld [vmem:[#allocation2 + $0x250] sm:$0xff]  ;;  %v514_v55 = vld [vmem:[#allocation2 + $0x278] sm:$0xff] }
 0x12f   : > { %v2993_v63 = vpack.c.bf16 %v429_v58, %v427_v51  ;;  %v2398_v51 = vcombine.high %v502_v46, %v506_v47  ;;  %v2404_v58 = vcombine.high %v509_v52, %v513_v53  ;;  %v518_v62 = vld [vmem:[#allocation2 + $0x298] sm:$0xff]  ;;  %v2403_v1 = vcombine.low %v509_v52, %v513_v53  ;;  %v2676_v52 = vld [vmem:[#allocation4 + $0x40] sm:$0xff]  }
 0x130   : > { %v2995_v3 = vpack.c.bf16 %v430_v61, %v428_v54  ;;  %1354 = vmatpush1.bf16.msra.mxu1 %v2339_v56  ;;  %1407 = vmatpush1.bf16.msra.mxu0 %v2341_v57  ;;  %v510_v54 = vld [vmem:[#allocation2 + $0x258] sm:$0xff]  ;;  %v2395_v56 = vcombine.low %v501_v44, %v505_v45  ;;  %v2397_v57 = vcombine.low %v502_v46, %v506_v47  ;;  %v521_v61 = vld [vmem:[#allocation2 + $0x2b0] sm:$0xff]  ;;  %v2677_v53 = vld [vmem:[#allocation4 + $0xc0] sm:$0xff]  }
 0x131   : > { %1355 = vmatprep.subr.bf16.mxu1 %v2348_v59  ;;  %1408 = vmatprep.subr.bf16.mxu0 %v2350_v60  ;;  %v2406_v59 = vcombine.high %v510_v54, %v514_v55  ;;  %v517_v60 = vld [vmem:[#allocation2 + $0x290] sm:$0xff]  ;;  %v522_v0 = vld [vmem:[#allocation2 + $0x2b8] sm:$0xff]  ;;  %v2405_v2 = vcombine.low %v510_v54, %v514_v55  ;;  %v2678_v54 = vld [vmem:[#allocation4] sm:$0xff]  }
 0x132   : > { %1287 = vmatprep.mubr.bf16.mxu1 %v2995_v3  ;;  %1340 = vmatprep.mubr.bf16.mxu0 %v2995_v3  ;;  %v2411_v10 = vcombine.low %v517_v60, %v521_v61  ;;  %v2413_v11 = vcombine.low %v518_v62, %v522_v0  ;;  %v534_v18 = vld [vmem:[#allocation2 + $0x318] sm:$0xff]  ;;  %v2679_v55 = vld [vmem:[#allocation4 + $0x80] sm:$0xff]  }
 0x133   : > { %1288 = vmatmul.mubr.bf16.gmra.mrb[4].mxu1 %v2993_v63  ;;  %1341 = vmatmul.mubr.bf16.gmra.mrb[12].mxu0 %v2993_v63  ;;  %v538_v20 = vld [vmem:[#allocation2 + $0x338] sm:$0xff] }
 0x134   : > { %1356 = vmatpush1.bf16.msra.mxu1 %v2347_v4  ;;  %1409 = vmatpush1.bf16.msra.mxu0 %v2349_v5  ;;  %v2412_v4 = vcombine.high %v517_v60, %v521_v61  ;;  %v2414_v5 = vcombine.high %v518_v62, %v522_v0  ;;  %v2429_v30 = vcombine.low %v534_v18, %v538_v20  ;;  %v550_v35 = vld [vmem:[#allocation2 + $0x398] sm:$0xff]  ;;  %v2684_v60 = vld [vmem:[#allocation4 + $0x50] sm:$0xff]  }
 0x135   : > { %1383 = vmatprep.mubr.bf16.mxu1 %v432_v39  ;;  %1436 = vmatprep.mubr.bf16.mxu0 %v432_v39  ;;  %v498_v39 = vld [vmem:[#allocation2 + $0x1f8] sm:$0xff]  ;;  %v2685_v61 = vld [vmem:[#allocation4 + $0xd0] sm:$0xff]  }
 0x136   : > { %1357 = vmatprep.subr.bf16.mxu1 %v2356_v7  ;;  %1410 = vmatprep.subr.bf16.mxu0 %v2358_v8  ;;  %v2390_v43 = vcombine.high %v494_v37, %v498_v39  ;;  %v2389_v49 = vcombine.low %v494_v37, %v498_v39  ;;  %v529_v7 = vld [vmem:[#allocation2 + $0x2f0] sm:$0xff]  ;;  %v526_v8 = vld [vmem:[#allocation2 + $0x2d8] sm:$0xff]  ;;  %v2437_v39 = vcombine.low %v542_v27, %v546_v28 }
 0x137   : > { %v2419_v21 = vcombine.low %v525_v6, %v529_v7  ;;  %v2421_v22 = vcombine.low %v526_v8, %v530_v9  ;;  %v554_v36 = vld [vmem:[#allocation2 + $0x3b8] sm:$0xff]  ;;  %v2686_v62 = vld [vmem:[#allocation4 + $0x10] sm:$0xff]  }
 0x138   : > { %1358 = vmatpush1.bf16.msra.mxu1 %v2355_v12  ;;  %1411 = vmatpush1.bf16.msra.mxu0 %v2357_v13  ;;  %v2420_v12 = vcombine.high %v525_v6, %v529_v7  ;;  %v2422_v13 = vcombine.high %v526_v8, %v530_v9  ;;  %v558_v44 = vld [vmem:[#allocation2 + $0x3d8] sm:$0xff]  ;;  %v2445_v47 = vcombine.low %v550_v35, %v554_v36  ;;  %v2687_v0 = vld [vmem:[#allocation4 + $0x90] sm:$0xff]   ;;  %v2694_v6 = vld [vmem:[#allocation4 + $0x20] sm:$0xff]  }
 0x139   : > { %1359 = vmatprep.subr.bf16.mxu1 %v2364_v14  ;;  %1412 = vmatprep.subr.bf16.mxu0 %v2366_v15  ;;  %v533_v14 = vld [vmem:[#allocation2 + $0x310] sm:$0xff]  ;;  %v562_v45 = vld [vmem:[#allocation2 + $0x3f8] sm:$0xff]  ;;  %v2695_v7 = vld [vmem:[#allocation4 + $0xa0] sm:$0xff]  }
 0x13a   : > { %v537_v15 = vld [vmem:[#allocation2 + $0x330] sm:$0xff]  ;;  %v2696_v8 = vld [vmem:[#allocation4 + $0x68] sm:$0xff]  }
 0x13b   : > { %v2427_v29 = vcombine.low %v533_v14, %v537_v15  ;;  %v2697_v9 = vld [vmem:[#allocation4 + $0xe8] sm:$0xff]  }
 0x13c   : > { %1360 = vmatpush1.bf16.msra.mxu1 %v2363_v23  ;;  %1413 = vmatpush1.bf16.msra.mxu0 %v2365_v24  ;;  %v2428_v23 = vcombine.high %v533_v14, %v537_v15  ;;  %v2430_v24 = vcombine.high %v534_v18, %v538_v20  ;;  %v2703_v14 = vld [vmem:[#allocation4 + $0xb0] sm:$0xff]   ;;  %v2704_v15 = vld [vmem:[#allocation4 + $0x78] sm:$0xff]  }
 0x13d   : > { %1361 = vmatprep.subr.bf16.mxu1 %v2372_v25  ;;  %1414 = vmatprep.subr.bf16.mxu0 %v2374_v26  ;;  %v541_v25 = vld [vmem:[#allocation2 + $0x350] sm:$0xff]  ;;  %v2705_v18 = vld [vmem:[#allocation4 + $0xf8] sm:$0xff]  }
 0x13e   : > { %v545_v26 = vld [vmem:[#allocation2 + $0x370] sm:$0xff]  ;;  %v2706_v20 = vld [vmem:[#allocation4 + $0x38] sm:$0xff]  }
 0x13f   : > { %v2435_v37 = vcombine.low %v541_v25, %v545_v26 }
 0x140   : > { %1362 = vmatpush1.bf16.msra.mxu1 %v2371_v31  ;;  %1415 = vmatpush1.bf16.msra.mxu0 %v2373_v32  ;;  %v2436_v31 = vcombine.high %v541_v25, %v545_v26  ;;  %v2438_v32 = vcombine.high %v542_v27, %v546_v28  ;;  %v3011_v25 = vld [vmem:[%s3044_s4] sm:$0xff]  ;;  %v579_v26 = vsub.s32 3, %v2978_v16 }
 0x141   : > { %1363 = vmatprep.subr.bf16.mxu1 %v2380_v33  ;;  %1416 = vmatprep.subr.bf16.mxu0 %v2382_v34  ;;  %v549_v33 = vld [vmem:[#allocation2 + $0x390] sm:$0xff]  ;;  %v568_v27 = vrot.slane %v3011_v25, %v325_v17 }
 0x142   : > { %v553_v34 = vld [vmem:[#allocation2 + $0x3b0] sm:$0xff] }
 0x143   : > { %v2443_v46 = vcombine.low %v549_v33, %v553_v34 }
 0x144   : > { %1364 = vmatpush1.bf16.msra.mxu1 %v2379_v40  ;;  %1417 = vmatpush1.bf16.msra.mxu0 %v2381_v41  ;;  %v2444_v40 = vcombine.high %v549_v33, %v553_v34  ;;  %v2446_v41 = vcombine.high %v550_v35, %v554_v36 }
 0x145   : > { %1365 = vmatprep.subr.bf16.mxu1 %v2388_v42  ;;  %1418 = vmatprep.subr.bf16.mxu0 %v2390_v43  ;;  %v557_v42 = vld [vmem:[#allocation2 + $0x3d0] sm:$0xff] }
 0x146   : > { %v561_v43 = vld [vmem:[#allocation2 + $0x3f0] sm:$0xff] }
 0x148   : > { %1366 = vmatpush1.bf16.msra.mxu1 %v2387_v48  ;;  %1419 = vmatpush1.bf16.msra.mxu0 %v2389_v49  ;;  %v2452_v48 = vcombine.high %v557_v42, %v561_v43  ;;  %v2454_v49 = vcombine.high %v558_v44, %v562_v45 }
 0x149   : > { %1367 = vmatprep.subr.bf16.mxu1 %v2396_v50  ;;  %1420 = vmatprep.subr.bf16.mxu0 %v2398_v51  ;;  %v2451_v50 = vcombine.low %v557_v42, %v561_v43  ;;  %v2453_v51 = vcombine.low %v558_v44, %v562_v45 }
 0x14c   : > { %1368 = vmatpush1.bf16.msra.mxu1 %v2395_v56  ;;  %1421 = vmatpush1.bf16.msra.mxu0 %v2397_v57  ;;  %v2680_v56 = vld [vmem:[#allocation4 + $0x48] sm:$0xff]  }
 0x14d   : > { %1369 = vmatprep.subr.bf16.mxu1 %v2404_v58  ;;  %1422 = vmatprep.subr.bf16.mxu0 %v2406_v59  ;;  %v2681_v57 = vld [vmem:[#allocation4 + $0xc8] sm:$0xff]  }
 0x14e   : > { %v2682_v58 = vld [vmem:[#allocation4 + $0x8] sm:$0xff]  }
 0x14f   : > { %v2683_v59 = vld [vmem:[#allocation4 + $0x88] sm:$0xff]  }
 0x150   : > { %1370 = vmatpush1.bf16.msra.mxu1 %v2403_v1  ;;  %1423 = vmatpush1.bf16.msra.mxu0 %v2405_v2  ;;  %v2688_v1 = vld [vmem:[#allocation4 + $0x58] sm:$0xff]  }
 0x151   : > { %1371 = vmatprep.subr.bf16.mxu1 %v2412_v4  ;;  %1424 = vmatprep.subr.bf16.mxu0 %v2414_v5  ;;  %v2691_v2 = vld [vmem:[#allocation4 + $0x98] sm:$0xff]   ;;  %v2692_v4 = vld [vmem:[#allocation4 + $0x60] sm:$0xff]  }
 0x152   : > { %v2693_v5 = vld [vmem:[#allocation4 + $0xe0] sm:$0xff]  }
 0x154   : > { %1372 = vmatpush1.bf16.msra.mxu1 %v2411_v10  ;;  %1425 = vmatpush1.bf16.msra.mxu0 %v2413_v11  ;;  %v2698_v10 = vld [vmem:[#allocation4 + $0x28] sm:$0xff]   ;;  %v2700_v11 = vld [vmem:[#allocation4 + $0x70] sm:$0xff]  }
 0x155   : > { %1373 = vmatprep.subr.bf16.mxu1 %v2420_v12  ;;  %1426 = vmatprep.subr.bf16.mxu0 %v2422_v13  ;;  %v2701_v12 = vld [vmem:[#allocation4 + $0xf0] sm:$0xff]  }
 0x156   : > { %v2702_v13 = vld [vmem:[#allocation4 + $0x30] sm:$0xff]  }
 0x158   : > { %1374 = vmatpush1.bf16.msra.mxu1 %v2419_v21  ;;  %1427 = vmatpush1.bf16.msra.mxu0 %v2421_v22  ;;  %v2707_v21 = vld [vmem:[#allocation4 + $0xb8] sm:$0xff]   ;;  %v2708_v22 = vld [vmem:[#allocation4 + $0x140] sm:$0xff]  }
 0x159   : > { %1375 = vmatprep.subr.bf16.mxu1 %v2428_v23  ;;  %1428 = vmatprep.subr.bf16.mxu0 %v2430_v24  ;;  %v2709_v23 = vld [vmem:[#allocation4 + $0x1c0] sm:$0xff]   ;;  %v575_v24 = vsub.s32 2, %v2978_v16 }
 0x15b   : > { %v576_v28 = vrot.slane %v3011_v25, %v575_v24  ;;  %v2716_v24 = vld [vmem:[#allocation4 + $0x150] sm:$0xff]  }
 0x15c   : > { %1376 = vmatpush1.bf16.msra.mxu1 %v2427_v29  ;;  %1429 = vmatpush1.bf16.msra.mxu0 %v2429_v30  ;;  %v572_v29 = vrot.slane %v3011_v25, %v329_v19  ;;  %v580_v30 = vrot.slane %v3011_v25, %v579_v26  ;;  %v2717_v26 = vld [vmem:[#allocation4 + $0x1d0] sm:$0xff]  }
 0x15d   : > { %1377 = vmatprep.subr.bf16.mxu1 %v2436_v31  ;;  %1430 = vmatprep.subr.bf16.mxu0 %v2438_v32 }
 0x160   : > { %1378 = vmatpush1.bf16.msra.mxu1 %v2435_v37  ;;  %1431 = vmatpush1.bf16.msra.mxu0 %v2437_v39 }
 0x161   : > { %1379 = vmatprep.subr.bf16.mxu1 %v2444_v40  ;;  %1432 = vmatprep.subr.bf16.mxu0 %v2446_v41 }
 0x164   : > { %1380 = vmatpush1.bf16.msra.mxu1 %v2443_v46  ;;  %1433 = vmatpush1.bf16.msra.mxu0 %v2445_v47 }
 0x165   : > { %1381 = vmatprep.subr.bf16.mxu1 %v2452_v48  ;;  %1434 = vmatprep.subr.bf16.mxu0 %v2454_v49 }
 0x168   : > { %1382 = vmatpush1.bf16.msra.mxu1 %v2451_v50  ;;  %1435 = vmatpush1.bf16.msra.mxu0 %v2453_v51 }
 0x169   : > { %2522 = vmatprep.subr.bf16.mxu1 %v2676_v52  ;;  %2550 = vmatprep.subr.bf16.mxu0 %v2677_v53 }
 0x16b   : > { %1384 = vmatmul.mubr.bf16.vlgmr.msra.gmra.mrb[8].mxu1 %v2989_v38  ;;  %1437 = vmatmul.mubr.bf16.vlgmr.msra.gmra.mrb[16].mxu0 %v2989_v38  ;;  %v2689_v38 = vld [vmem:[#allocation4 + $0xd8] sm:$0xff]  }
 0x16c   : > { %1393 = vmatprep.mubr.bf16.mxu1 %v2995_v3  ;;  %1446 = vmatprep.mubr.bf16.mxu0 %v2995_v3  ;;  %v2690_v3 = vld [vmem:[#allocation4 + $0x18] sm:$0xff]  }
 0x16d   : > { %2523 = vmatpush3.bf16.msra.mxu1 %v2678_v54  ;;  %2551 = vmatpush3.bf16.msra.mxu0 %v2679_v55 }
 0x16e   : > { %2524 = vmatprep.subr.bf16.mxu1 %v2680_v56  ;;  %2552 = vmatprep.subr.bf16.mxu0 %v2681_v57 }
 0x171   : > { %2525 = vmatpush3.bf16.msra.mxu1 %v2682_v58  ;;  %2553 = vmatpush3.bf16.msra.mxu0 %v2683_v59  ;;  %v2710_v59 = vld [vmem:[#allocation4 + $0x100] sm:$0xff]  }
 0x172   : > { %2526 = vmatprep.subr.bf16.mxu1 %v2684_v60  ;;  %2554 = vmatprep.subr.bf16.mxu0 %v2685_v61  ;;  %v2711_v60 = vld [vmem:[#allocation4 + $0x180] sm:$0xff]  }
 0x173   : > { %1394 = vmatmul.mubr.bf16.gmra.mrb[12].mxu1 %v2993_v63  ;;  %1447 = vmatmul.mubr.bf16.gmra.mrb[20].mxu0 %v2993_v63  ;;  %v2699_v63 = vld [vmem:[#allocation4 + $0xa8] sm:$0xff]  }
 0x175   : > { %2527 = vmatpush3.bf16.msra.mxu1 %v2686_v62  ;;  %2555 = vmatpush3.bf16.msra.mxu0 %v2687_v0 }
 0x176   : > { %2528 = vmatprep.subr.bf16.mxu1 %v2688_v1  ;;  %2556 = vmatprep.subr.bf16.mxu0 %v2689_v38 }
 0x179   : > { %2529 = vmatpush3.bf16.msra.mxu1 %v2690_v3  ;;  %2557 = vmatpush3.bf16.msra.mxu0 %v2691_v2  ;;  %v2712_v3 = vld [vmem:[#allocation4 + $0x148] sm:$0xff]  }
 0x17a   : > { %2530 = vmatprep.subr.bf16.mxu1 %v2692_v4  ;;  %2558 = vmatprep.subr.bf16.mxu0 %v2693_v5  ;;  %v2713_v2 = vld [vmem:[#allocation4 + $0x1c8] sm:$0xff]  }
 0x17d   : > { %2531 = vmatpush3.bf16.msra.mxu1 %v2694_v6  ;;  %2559 = vmatpush3.bf16.msra.mxu0 %v2695_v7 }
 0x17e   : > { %2532 = vmatprep.subr.bf16.mxu1 %v2696_v8  ;;  %2560 = vmatprep.subr.bf16.mxu0 %v2697_v9 }
 0x181   : > { %2533 = vmatpush3.bf16.msra.mxu1 %v2698_v10  ;;  %2561 = vmatpush3.bf16.msra.mxu0 %v2699_v63 }
 0x182   : > { %2534 = vmatprep.subr.bf16.mxu1 %v2700_v11  ;;  %2562 = vmatprep.subr.bf16.mxu0 %v2701_v12 }
 0x185   : > { %2535 = vmatpush3.bf16.msra.mxu1 %v2702_v13  ;;  %2563 = vmatpush3.bf16.msra.mxu0 %v2703_v14 }
 0x186   : > { %2536 = vmatprep.subr.bf16.mxu1 %v2704_v15  ;;  %2564 = vmatprep.subr.bf16.mxu0 %v2705_v18 }
 0x189   : > { %2537 = vmatpush3.bf16.msra.mxu1 %v2706_v20  ;;  %2565 = vmatpush3.bf16.msra.mxu0 %v2707_v21  ;;  %v2714_v20 = vld [vmem:[#allocation4 + $0x108] sm:$0xff]  }
 0x18a   : > { %2578 = vmatprep.subr.bf16.mxu1 %v2708_v22  ;;  %2606 = vmatprep.subr.bf16.mxu0 %v2709_v23  ;;  %v2715_v21 = vld [vmem:[#allocation4 + $0x188] sm:$0xff]  }
 0x1fe   : > { %v1279_v31 = vpop.f32.mrb[0].mxu1  ;;  %v1332_v32 = vpop.f32.mrb[8].mxu0 }
 0x1ff   : > { %v1280_v33 = vadd.f32 %v1279_v31, %v568_v27  ;;  %v1333_v34 = vadd.f32 %v1332_v32, %v576_v28  ;;  %v1281_v35 = vpop.f32.mrb[1].mxu1  ;;  %v1334_v36 = vpop.f32.mrb[9].mxu0 }
 0x200   : > { %v1282_v37 = vadd.f32 %v1281_v35, %v572_v29  ;;  %v1335_v39 = vadd.f32 %v1334_v36, %v580_v30  ;;  %v1283_v40 = vpop.f32.mrb[2].mxu1  ;;  %v1336_v41 = vpop.f32.mrb[10].mxu0  ;;  %v2718_v35 = vld [vmem:[#allocation4 + $0x110] sm:$0xff]   ;;  %v2721_v36 = vld [vmem:[#allocation4 + $0x1d8] sm:$0xff]  }
 0x201   : > { %v1284_v42 = vadd.f32 %v1283_v40, %v568_v27  ;;  %v1337_v17 = vadd.f32 %v1336_v41, %v576_v28  ;;  %v1285_v43 = vpop.f32.mrb[3].mxu1  ;;  %v1338_v44 = vpop.f32.mrb[11].mxu0  ;;  %v1457_v47 = vmax.f32 %v1280_v33, 0.0  ;;  %v1459_v19 = vmax.f32 %v1333_v34, 0.0  ;;  %v2724_v40 = vld [vmem:[#allocation4 + $0x160] sm:$0xff]  }
 0x202   : > { %v1286_v45 = vadd.f32 %v1285_v43, %v572_v29  ;;  %v1339_v46 = vadd.f32 %v1338_v44, %v580_v30  ;;  %v1458_v50 = vmax.f32 %v1282_v37, 0.0  ;;  %v1460_v51 = vmax.f32 %v1335_v39, 0.0  ;;  %v2722_v37 = vld [vmem:[#allocation4 + $0x118] sm:$0xff]   ;;  %v2725_v41 = vld [vmem:[#allocation4 + $0x1e0] sm:$0xff]   ;;  %v2728_v43 = vld [vmem:[#allocation4 + $0x168] sm:$0xff]  }
 0x203   : > { %v1465_v48 = vmax.f32 %v1284_v42, 0.0  ;;  %v1467_v49 = vmax.f32 %v1337_v17, 0.0  ;;  %v2723_v39 = vld [vmem:[#allocation4 + $0x198] sm:$0xff]   ;;  %v2726_v42 = vld [vmem:[#allocation4 + $0x120] sm:$0xff]   ;;  %v2729_v44 = vld [vmem:[#allocation4 + $0x1e8] sm:$0xff]  }
 0x204   : > { %v1466_v52 = vmax.f32 %v1286_v45, 0.0  ;;  %v1468_v53 = vmax.f32 %v1339_v46, 0.0  ;;  %v2727_v17 = vld [vmem:[#allocation4 + $0x1a0] sm:$0xff]   ;;  %v2730_v45 = vld [vmem:[#allocation4 + $0x128] sm:$0xff]  }
 0x205   : > { %v1489_v54 = vpack.c.bf16 %v1465_v48, %v1457_v47  ;;  %v1491_v55 = vpack.c.bf16 %v1467_v49, %v1459_v19  ;;  %v2731_v46 = vld [vmem:[#allocation4 + $0x1a8] sm:$0xff]   ;;  %v2732_v47 = vld [vmem:[#allocation4 + $0x170] sm:$0xff]  }
 0x206   : > { %v1490_v56 = vpack.c.bf16 %v1466_v52, %v1458_v50  ;;  %v1492_v57 = vpack.c.bf16 %v1468_v53, %v1460_v51  ;;  %v1289_v58 = vpop.f32.mrb[4].mxu1  ;;  %v1342_v61 = vpop.f32.mrb[12].mxu0  ;;  %v2733_v19 = vld [vmem:[#allocation4 + $0x1f0] sm:$0xff]   ;;  %v2736_v50 = vld [vmem:[#allocation4 + $0x178] sm:$0xff]  }
 0x207   : > { %v1290_v62 = vadd.f32 %v1289_v58, %v568_v27  ;;  %v1291_v0 = vpop.f32.mrb[5].mxu1  ;;  %v1343_v1 = vadd.f32 %v1342_v61, %v576_v28  ;;  %v1344_v38 = vpop.f32.mrb[13].mxu0  ;;  %v2734_v48 = vld [vmem:[#allocation4 + $0x130] sm:$0xff]   ;;  %v2737_v51 = vld [vmem:[#allocation4 + $0x1f8] sm:$0xff]  }
 0x208   : > { %2056 = vmatprep.mubr.bf16.mxu1 %v1490_v56  ;;  %2105 = vmatprep.mubr.bf16.mxu0 %v1492_v57  ;;  %v1292_v4 = vadd.f32 %v1291_v0, %v572_v29  ;;  %v1293_v5 = vpop.f32.mrb[6].mxu1  ;;  %v1345_v6 = vadd.f32 %v1344_v38, %v580_v30  ;;  %v1346_v7 = vpop.f32.mrb[14].mxu0  ;;  %v2735_v49 = vld [vmem:[#allocation4 + $0x1b0] sm:$0xff]   ;;  %v2738_v52 = vld [vmem:[#allocation4 + $0x138] sm:$0xff]   ;;  %v587_v56 = vsub.s32 5, %v2978_v16  ;;  %v595_v57 = vsub.s32 7, %v2978_v16 }
 0x209   : > { %2057 = vmatmul.mubr.bf16.vlgmr.msra.gmra.mrb[16].mxu1 %v1489_v54  ;;  %2106 = vmatmul.mubr.bf16.vlgmr.msra.gmra.mrb[24].mxu0 %v1491_v55  ;;  %v1473_v8 = vmax.f32 %v1290_v62, 0.0  ;;  %v1294_v9 = vadd.f32 %v1293_v5, %v568_v27  ;;  %v1475_v10 = vmax.f32 %v1343_v1, 0.0  ;;  %v1295_v63 = vpop.f32.mrb[7].mxu1  ;;  %v1347_v11 = vadd.f32 %v1346_v7, %v576_v28  ;;  %v1348_v12 = vpop.f32.mrb[15].mxu0  ;;  %v2739_v53 = vld [vmem:[#allocation4 + $0x1b8] sm:$0xff]  }
 0x20a   : > { %v1474_v13 = vmax.f32 %v1292_v4, 0.0  ;;  %2579 = vmatpush3.bf16.msra.mxu1 %v2710_v59  ;;  %2607 = vmatpush3.bf16.msra.mxu0 %v2711_v60  ;;  %v1296_v14 = vadd.f32 %v1295_v63, %v572_v29  ;;  %v1476_v15 = vmax.f32 %v1345_v6, 0.0  ;;  %v1349_v18 = vadd.f32 %v1348_v12, %v580_v30  ;;  %v2719_v29 = vld [vmem:[#allocation4 + $0x190] sm:$0xff]   ;;  %v2720_v30 = vld [vmem:[#allocation4 + $0x158] sm:$0xff]  }
 0x20b   : > { %v1481_v22 = vmax.f32 %v1294_v9, 0.0  ;;  %v1483_v23 = vmax.f32 %v1347_v11, 0.0  ;;  %2580 = vmatprep.subr.bf16.mxu1 %v2712_v3  ;;  %2608 = vmatprep.subr.bf16.mxu0 %v2713_v2  ;;  %v583_v54 = vsub.s32 4, %v2978_v16  ;;  %v591_v55 = vsub.s32 6, %v2978_v16 }
 0x20c   : > { %v1482_v31 = vmax.f32 %v1296_v14, 0.0  ;;  %v1484_v27 = vmax.f32 %v1349_v18, 0.0  ;;  %v588_v60 = vrot.slane %v3011_v25, %v587_v56  ;;  %v596_v61 = vrot.slane %v3011_v25, %v595_v57  ;;  %v2455_v56 = vld [vmem:[%s3046_s6] ss:$0 sm:$0xff] }
 0x20d   : > { %v1497_v32 = vpack.c.bf16 %v1481_v22, %v1473_v8  ;;  %v1499_v33 = vpack.c.bf16 %v1483_v23, %v1475_v10  ;;  %v584_v58 = vrot.slane %v3011_v25, %v583_v54  ;;  %v592_v59 = vrot.slane %v3011_v25, %v591_v55 }
 0x20e   : > { %v1498_v28 = vpack.c.bf16 %v1482_v31, %v1474_v13  ;;  %v1500_v34 = vpack.c.bf16 %v1484_v27, %v1476_v15  ;;  %2581 = vmatpush3.bf16.msra.mxu1 %v2714_v20  ;;  %2609 = vmatpush3.bf16.msra.mxu0 %v2715_v21 }
 0x20f   : > { %2582 = vmatprep.subr.bf16.mxu1 %v2716_v24  ;;  %2610 = vmatprep.subr.bf16.mxu0 %v2717_v26 }
 0x210   : > { %2064 = vmatprep.mubr.bf16.mxu1 %v1498_v28  ;;  %2113 = vmatprep.mubr.bf16.mxu0 %v1500_v34 }
 0x211   : > { %2065 = vmatmul.mubr.bf16.gmra.mrb[20].mxu1 %v1497_v32  ;;  %2114 = vmatmul.mubr.bf16.gmra.mrb[28].mxu0 %v1499_v33 }
 0x212   : > { %2583 = vmatpush3.bf16.msra.mxu1 %v2718_v35  ;;  %2611 = vmatpush3.bf16.msra.mxu0 %v2719_v29 }
 0x213   : > { %2584 = vmatprep.subr.bf16.mxu1 %v2720_v30  ;;  %2612 = vmatprep.subr.bf16.mxu0 %v2721_v36 }
 0x216   : > { %2585 = vmatpush3.bf16.msra.mxu1 %v2722_v37  ;;  %2613 = vmatpush3.bf16.msra.mxu0 %v2723_v39 }
 0x217   : > { %2586 = vmatprep.subr.bf16.mxu1 %v2724_v40  ;;  %2614 = vmatprep.subr.bf16.mxu0 %v2725_v41 }
 0x21a   : > { %2587 = vmatpush3.bf16.msra.mxu1 %v2726_v42  ;;  %2615 = vmatpush3.bf16.msra.mxu0 %v2727_v17 }
 0x21b   : > { %2588 = vmatprep.subr.bf16.mxu1 %v2728_v43  ;;  %2616 = vmatprep.subr.bf16.mxu0 %v2729_v44 }
 0x21e   : > { %2589 = vmatpush3.bf16.msra.mxu1 %v2730_v45  ;;  %2617 = vmatpush3.bf16.msra.mxu0 %v2731_v46 }
 0x21f   : > { %2590 = vmatprep.subr.bf16.mxu1 %v2732_v47  ;;  %2618 = vmatprep.subr.bf16.mxu0 %v2733_v19 }
 0x222   : > { %2591 = vmatpush3.bf16.msra.mxu1 %v2734_v48  ;;  %2619 = vmatpush3.bf16.msra.mxu0 %v2735_v49 }
 0x223   : > { %2592 = vmatprep.subr.bf16.mxu1 %v2736_v50  ;;  %2620 = vmatprep.subr.bf16.mxu0 %v2737_v51 }
 0x226   : > { %2593 = vmatpush3.bf16.msra.mxu1 %v2738_v52  ;;  %2621 = vmatpush3.bf16.msra.mxu0 %v2739_v53 }
 0x23e   : > { %v1385_v62 = vpop.f32.mrb[8].mxu1  ;;  %v1438_v0 = vpop.f32.mrb[16].mxu0 }
 0x23f   : > { %v1386_v1 = vadd.f32 %v1385_v62, %v584_v58  ;;  %v1439_v38 = vadd.f32 %v1438_v0, %v592_v59  ;;  %v1387_v3 = vpop.f32.mrb[9].mxu1  ;;  %v1440_v2 = vpop.f32.mrb[17].mxu0 }
 0x240   : > { %v1388_v4 = vadd.f32 %v1387_v3, %v588_v60  ;;  %v1441_v5 = vadd.f32 %v1440_v2, %v596_v61  ;;  %v1389_v6 = vpop.f32.mrb[10].mxu1  ;;  %v1442_v7 = vpop.f32.mrb[18].mxu0 }
 0x241   : > { %v1390_v8 = vadd.f32 %v1389_v6, %v584_v58  ;;  %v1443_v16 = vadd.f32 %v1442_v7, %v592_v59  ;;  %v1391_v9 = vpop.f32.mrb[11].mxu1  ;;  %v1444_v10 = vpop.f32.mrb[19].mxu0  ;;  %v1461_v12 = vmax.f32 %v1386_v1, 0.0  ;;  %v1463_v13 = vmax.f32 %v1439_v38, 0.0 }
 0x242   : > { %v1392_v63 = vadd.f32 %v1391_v9, %v588_v60  ;;  %v1445_v11 = vadd.f32 %v1444_v10, %v596_v61  ;;  %v1462_v15 = vmax.f32 %v1388_v4, 0.0  ;;  %v1464_v18 = vmax.f32 %v1441_v5, 0.0 }
 0x243   : > { %v1469_v14 = vmax.f32 %v1390_v8, 0.0  ;;  %v1471_v25 = vmax.f32 %v1443_v16, 0.0 }
 0x244   : > { %v1470_v20 = vmax.f32 %v1392_v63, 0.0  ;;  %v1472_v21 = vmax.f32 %v1445_v11, 0.0 }
 0x245   : > { %v1493_v22 = vpack.c.bf16 %v1469_v14, %v1461_v12  ;;  %v1495_v23 = vpack.c.bf16 %v1471_v25, %v1463_v13 }
 0x246   : > { %v1494_v24 = vpack.c.bf16 %v1470_v20, %v1462_v15  ;;  %v1496_v26 = vpack.c.bf16 %v1472_v21, %v1464_v18  ;;  %v1395_v31 = vpop.f32.mrb[12].mxu1  ;;  %v1448_v27 = vpop.f32.mrb[20].mxu0 }
 0x247   : > { %v1396_v32 = vadd.f32 %v1395_v31, %v584_v58  ;;  %v1449_v33 = vadd.f32 %v1448_v27, %v592_v59  ;;  %v1397_v28 = vpop.f32.mrb[13].mxu1  ;;  %v1450_v34 = vpop.f32.mrb[21].mxu0 }
 0x248   : > { %v1398_v35 = vadd.f32 %v1397_v28, %v588_v60  ;;  %v1451_v29 = vadd.f32 %v1450_v34, %v596_v61  ;;  %v1399_v30 = vpop.f32.mrb[14].mxu1  ;;  %v1452_v36 = vpop.f32.mrb[22].mxu0  ;;  %2154 = vmatprep.mubr.bf16.mxu1 %v1494_v24  ;;  %2203 = vmatprep.mubr.bf16.mxu0 %v1496_v26 }
 0x249   : > { %v1400_v37 = vadd.f32 %v1399_v30, %v584_v58  ;;  %v1453_v39 = vadd.f32 %v1452_v36, %v592_v59  ;;  %v1401_v40 = vpop.f32.mrb[15].mxu1  ;;  %v1454_v41 = vpop.f32.mrb[23].mxu0  ;;  %2155 = vmatmul.mubr.bf16.vlgmr.msra.gmra.mrb[24].mxu1 %v1493_v22  ;;  %2204 = vmatmul.mubr.bf16.vlgmr.msra.gmra.mrb[32].mxu0 %v1495_v23  ;;  %v1477_v43 = vmax.f32 %v1396_v32, 0.0  ;;  %v1479_v44 = vmax.f32 %v1449_v33, 0.0 }
 0x24a   : > { %v1402_v42 = vadd.f32 %v1401_v40, %v588_v60  ;;  %v1455_v17 = vadd.f32 %v1454_v41, %v596_v61  ;;  %v1478_v47 = vmax.f32 %v1398_v35, 0.0  ;;  %v1480_v19 = vmax.f32 %v1451_v29, 0.0 }
 0x24b   : > { %v1485_v45 = vmax.f32 %v1400_v37, 0.0  ;;  %v1487_v46 = vmax.f32 %v1453_v39, 0.0 }
 0x24c   : > { %v1486_v48 = vmax.f32 %v1402_v42, 0.0  ;;  %v1488_v49 = vmax.f32 %v1455_v17, 0.0 }
 0x24d   : > { %v1501_v50 = vpack.c.bf16 %v1485_v45, %v1477_v43  ;;  %v1503_v51 = vpack.c.bf16 %v1487_v46, %v1479_v44 }
 0x24e   : > { %v1502_v52 = vpack.c.bf16 %v1486_v48, %v1478_v47  ;;  %v1504_v53 = vpack.c.bf16 %v1488_v49, %v1480_v19 }
 0x250   : > { %2162 = vmatprep.mubr.bf16.mxu1 %v1502_v52  ;;  %2211 = vmatprep.mubr.bf16.mxu0 %v1504_v53 }
 0x251   : > { %2163 = vmatmul.mubr.bf16.gmra.mrb[28].mxu1 %v1501_v50  ;;  %2212 = vmatmul.mubr.bf16.gmra.mrb[36].mxu0 %v1503_v51 }
 0x2dc   : > { %v2538_v54 = vpop.f32.mrb[16].mxu1  ;;  %v2566_v55 = vpop.f32.mrb[24].mxu0 }
 0x2dd   : > { %v2539_v57 = vpop.f32.mrb[17].mxu1  ;;  %v2567_v58 = vpop.f32.mrb[25].mxu0 }
 0x2de   : > { %v2540_v59 = vadd.f32 %v2539_v57, %v2538_v54  ;;  %v2568_v60 = vadd.f32 %v2567_v58, %v2566_v55  ;;  %v2541_v61 = vpop.f32.mrb[18].mxu1  ;;  %v2569_v62 = vpop.f32.mrb[26].mxu0 }
 0x2df   : > { %v2542_v0 = vpop.f32.mrb[19].mxu1  ;;  %v2570_v1 = vpop.f32.mrb[27].mxu0 }
 0x2e0   : > { %v2059_v38 = vadd.f32 %v2540_v59, %v2455_v56  ;;  %v2543_v3 = vadd.f32 %v2542_v0, %v2541_v61  ;;  %v2571_v2 = vadd.f32 %v2570_v1, %v2569_v62 }
 0x2e2   : > { %v2108_v4 = vadd.f32 %v2568_v60, %v2059_v38  ;;  %v2062_v5 = vadd.f32 %v2543_v3, %v2455_v56 }
 0x2e4   : > { %v2111_v6 = vadd.f32 %v2571_v2, %v2062_v5  ;;  %v2544_v7 = vpop.f32.mrb[20].mxu1  ;;  %v2572_v8 = vpop.f32.mrb[28].mxu0 }
 0x2e5   : > { %v2545_v16 = vpop.f32.mrb[21].mxu1  ;;  %v2573_v9 = vpop.f32.mrb[29].mxu0 }
 0x2e6   : > { %v2546_v10 = vadd.f32 %v2545_v16, %v2544_v7  ;;  %v2547_v63 = vpop.f32.mrb[22].mxu1  ;;  %v2574_v11 = vadd.f32 %v2573_v9, %v2572_v8  ;;  %v2575_v12 = vpop.f32.mrb[30].mxu0 }
 0x2e7   : > { %v2548_v13 = vpop.f32.mrb[23].mxu1  ;;  %v2576_v14 = vpop.f32.mrb[31].mxu0 }
 0x2e8   : > { %v2067_v25 = vadd.f32 %v2546_v10, %v2455_v56  ;;  %v2549_v15 = vadd.f32 %v2548_v13, %v2547_v63  ;;  %v2577_v18 = vadd.f32 %v2576_v14, %v2575_v12 }
 0x2ea   : > { %v2070_v20 = vadd.f32 %v2549_v15, %v2455_v56  ;;  %v2116_v21 = vadd.f32 %v2574_v11, %v2067_v25 }
 0x2ec   : > { %v2119_v22 = vadd.f32 %v2577_v18, %v2070_v20 }
 0x31c   : > { %v2594_v23 = vpop.f32.mrb[24].mxu1  ;;  %v2622_v24 = vpop.f32.mrb[32].mxu0 }
 0x31d   : > { %v2595_v26 = vpop.f32.mrb[25].mxu1  ;;  %v2623_v31 = vpop.f32.mrb[33].mxu0 }
 0x31e   : > { %v2596_v27 = vadd.f32 %v2595_v26, %v2594_v23  ;;  %v2624_v32 = vadd.f32 %v2623_v31, %v2622_v24  ;;  %v2597_v33 = vpop.f32.mrb[26].mxu1  ;;  %v2625_v28 = vpop.f32.mrb[34].mxu0 }
 0x31f   : > { %v2598_v34 = vpop.f32.mrb[27].mxu1  ;;  %v2626_v35 = vpop.f32.mrb[35].mxu0 }
 0x320   : > { %v2157_v29 = vadd.f32 %v2596_v27, %v2108_v4  ;;  %v2599_v30 = vadd.f32 %v2598_v34, %v2597_v33  ;;  %v2627_v36 = vadd.f32 %v2626_v35, %v2625_v28 }
 0x322   : > { %v2206_v37 = vadd.f32 %v2624_v32, %v2157_v29  ;;  %v2160_v39 = vadd.f32 %v2599_v30, %v2111_v6 }
 0x324   : > { %2740 = vtanh.f32 %v2206_v37  ;;  %v2209_v40 = vadd.f32 %v2627_v36, %v2160_v39  ;;  %v2600_v41 = vpop.f32.mrb[28].mxu1  ;;  %v2628_v42 = vpop.f32.mrb[36].mxu0 }
 0x325   : > { %v2601_v17 = vpop.f32.mrb[29].mxu1  ;;  %v2629_v43 = vpop.f32.mrb[37].mxu0 }
 0x326   : > { %2742 = vtanh.f32 %v2209_v40  ;;  %v2602_v44 = vadd.f32 %v2601_v17, %v2600_v41  ;;  %v2630_v45 = vadd.f32 %v2629_v43, %v2628_v42  ;;  %v2603_v46 = vpop.f32.mrb[30].mxu1  ;;  %v2631_v47 = vpop.f32.mrb[38].mxu0 }
 0x327   : > { %v2604_v19 = vpop.f32.mrb[31].mxu1  ;;  %v2632_v48 = vpop.f32.mrb[39].mxu0 }
 0x328   : > { %v2165_v49 = vadd.f32 %v2602_v44, %v2116_v21  ;;  %v2605_v50 = vadd.f32 %v2604_v19, %v2603_v46  ;;  %v2633_v51 = vadd.f32 %v2632_v48, %v2631_v47 }
 0x32a   : > { %v2214_v52 = vadd.f32 %v2630_v45, %v2165_v49  ;;  %v2168_v53 = vadd.f32 %v2605_v50, %v2119_v22 }
 0x32c   : > { %2744 = vtanh.f32 %v2214_v52  ;;  %v2217_v54 = vadd.f32 %v2633_v51, %v2168_v53 }
 0x32e   : > { %v2741_v55 = vpop.eup %2740  ;;  %2746 = vtanh.f32 %v2217_v54 }
 0x32f   : > { %2224 = vst [vmem:[%s310_s28] sm:$0xff] %v2741_v55 }
 0x330   : > { %v2743_v56 = vpop.eup %2742 }
 0x331   : > { %2225 = vst [vmem:[%s310_s28 + $0x8] sm:$0xff] %v2743_v56 }
 0x336   : > { %v2745_v57 = vpop.eup %2744 }
 0x337   : > { %2226 = vst [vmem:[%s310_s28 + $0x10] sm:$0xff] %v2745_v57 }
 0x338   : > { %v2747_v58 = vpop.eup %2746 }
 0x339   : > { %2227 = vst [vmem:[%s310_s28 + $0x18] sm:$0xff] %v2747_v58 }
 0x33a PF: > { %s19_s24 = sadd.s32 1, %s2818_s24  }
 0x33b   : > { %p16_p2 = scmp.ge.s32.totalorder %s19_s24, 4  }
 0x33d   :  { %18 = sbr.rel (!%p16_p2) target bundleno = 2 (0x2), region = 87 }
 0x344   :  { %2250 = vsyncpa [#allocation3], 1 }
 0x345   :  { %2252 = vsyncpa [#allocation3 + $0x1], 1 }
 0x346   :  { %2253 = vsyncpa [#allocation5], 1 }

</bundles_post_ra>
